<compile_context>
chip_gen: v5e
topology: v5e:2x2
jax: 0.10.0
libtpu: 0.0.40
codegen_flags: <defaults>
</compile_context>

<pallas_src>
import functools

import jax
import jax.numpy as jnp
from jax import lax
from jax.experimental import pallas as pl
from jax.experimental.pallas import tpu as pltpu  # noqa: F401  (no scratch/DMA needed here)

# ---------------- model hyper-params (small, consistent with the module) -----
INPUT_DIM = 16
HIDDEN_DIM = 32
OUTPUT_DIM = 4
N_LAYERS = 2
BATCH = 2
SEQ = 8


# ---------------- fused Pallas kernel ----------------------------------------
def _lstm_net_kernel(n_layers, seq_len, *refs):
    """Fused forward: stacked LSTM layers (wavefront) + ReLU + FC.

    refs layout (all full-array VMEM refs, no grid, no scratch):
      inputs : x (T*BP, I)                       -- time-major, batch padded to BP
               [W_ih^T (in,4H), W_hh^T (H,4H), bias (1,4H)] * n_layers
                 (i/f/o gate columns pre-scaled by 0.5 -> single-tanh gates)
               h0 (L,BP,H), c0 (L,BP,H), fc_w^T (H,O), fc_b (1,O)
      outputs: out (BP,O), h_n (L,BP,H), c_n (L,BP,H)   -- padded; wrapper slices
    """
    n_in = 1 + 3 * n_layers + 4
    x_ref = refs[0]
    layer_refs = refs[1:1 + 3 * n_layers]
    h0_ref, c0_ref, fcw_ref, fcb_ref = refs[1 + 3 * n_layers:n_in]
    out_ref, hn_ref, cn_ref = refs[n_in:n_in + 3]

    BP = h0_ref.shape[1]          # padded batch (multiple of 8 -> aligned slices)
    H = h0_ref.shape[-1]

    # Lane-constant affine fixup turning one tanh pass into {sigmoid, tanh}:
    #   i/f/o lanes (weights pre-scaled 0.5): sigmoid(z) = 0.5*tanh(z/2) + 0.5
    #   g lanes (unscaled):                   tanh(z)    = 1.0*tanh(z)   + 0.0
    # Built once, hoisted out of the unrolled loop.
    lane = lax.broadcasted_iota(jnp.int32, (BP, 4 * H), 1)
    is_g = (lane >= 2 * H) & (lane < 3 * H)
    g_scale = jnp.where(is_g, 1.0, 0.5).astype(jnp.float32)
    g_off = jnp.where(is_g, 0.0, 0.5).astype(jnp.float32)

    def lstm_cell(g_lin, c_prev):
        act = jnp.tanh(g_lin) * g_scale + g_off          # single EUP pass
        i_g = act[:, 0:H]                                 # PyTorch order: i,f,g,o
        f_g = act[:, H:2 * H]
        g_g = act[:, 2 * H:3 * H]
        o_g = act[:, 3 * H:4 * H]
        c_new = f_g * c_prev + i_g * g_g
        h_new = o_g * jnp.tanh(c_new)
        return h_new, c_new

    # Load weights once (tiny, stay resident in vregs/VMEM).
    wih = [layer_refs[3 * l][...] for l in range(n_layers)]
    whh = [layer_refs[3 * l + 1][...] for l in range(n_layers)]
    bias = [layer_refs[3 * l + 2][...] for l in range(n_layers)]

    # Hoisted layer-0 input projection (+ bias) for all timesteps in one matmul.
    pre0 = jnp.dot(x_ref[...], wih[0], preferred_element_type=jnp.float32) + bias[0]

    h = [h0_ref[l] for l in range(n_layers)]
    c = [c0_ref[l] for l in range(n_layers)]

    # Wavefront: at step s, layer l processes timestep t = s - l.  Every active
    # layer's gates depend only on state produced at step s-1, so all matmuls
    # issued below are independent and overlap in the MXU pipeline.  Gates are
    # computed for ALL layers before ANY state is updated.
    for s in range(seq_len + n_layers - 1):
        gates = [None] * n_layers
        for l in range(n_layers):
            t = s - l
            if 0 <= t < seq_len:
                if l == 0:
                    gates[l] = (pre0[t * BP:(t + 1) * BP, :]
                                + jnp.dot(h[0], whh[0],
                                          preferred_element_type=jnp.float32))
                else:
                    # per-step input projection (prev layer's live h) + recurrence
                    gates[l] = (jnp.dot(h[l - 1], wih[l],
                                        preferred_element_type=jnp.float32)
                                + jnp.dot(h[l], whh[l],
                                          preferred_element_type=jnp.float32)
                                + bias[l])
        for l in range(n_layers):
            if gates[l] is not None:
                h[l], c[l] = lstm_cell(gates[l], c[l])

    for l in range(n_layers):
        hn_ref[l] = h[l]
        cn_ref[l] = c[l]

    # out[:, -1] of the top layer == its final hidden state (eval mode).
    x_fc = jnp.maximum(h[n_layers - 1], 0.0)
    out_ref[...] = (jnp.dot(x_fc, fcw_ref[...], preferred_element_type=jnp.float32)
                    + fcb_ref[...])


# ---------------- wrapper -----------------------------------------------------
@jax.jit
def lstm_net_forward(packed, x, h):
    """Equivalent of LSTMNet.forward(x, h) in eval mode.

    x: (B, T, input_dim)   (batch_first)
    h: (h0, c0), each (n_layers, B, hidden_dim)
    returns: (out (B, output_dim), (h_n, c_n) each (n_layers, B, hidden_dim))
    """
    h0_all, c0_all = h
    B, T, I = x.shape
    n_layers, _, H = h0_all.shape
    O = packed["fc_w_t"].shape[-1]
    BP = ((B + 7) // 8) * 8          # pad batch to the f32 sublane tile

    # time-major + zero-pad batch rows to BP; padded rows sliced off at the end
    x_tm = jnp.transpose(x, (1, 0, 2))                               # (T, B, I)
    x_pad = jnp.zeros((T, BP, I), jnp.float32).at[:, :B, :].set(x_tm)
    x_flat = x_pad.reshape(T * BP, I)

    h0_p = jnp.zeros((n_layers, BP, H), jnp.float32).at[:, :B, :].set(h0_all)
    c0_p = jnp.zeros((n_layers, BP, H), jnp.float32).at[:, :B, :].set(c0_all)

    flat_weights = []
    for wih_t, whh_t, b in packed["lstm"]:
        flat_weights += [wih_t, whh_t, b]

    kernel = functools.partial(_lstm_net_kernel, n_layers, T)
    out_p, hn_p, cn_p = pl.pallas_call(
        kernel,
        out_shape=(jax.ShapeDtypeStruct((BP, O), jnp.float32),
                   jax.ShapeDtypeStruct((n_layers, BP, H), jnp.float32),
                   jax.ShapeDtypeStruct((n_layers, BP, H), jnp.float32)),
    )(x_flat, *flat_weights, h0_p, c0_p, packed["fc_w_t"], packed["fc_b"])

    # drop padded batch rows (review correctness concern)
    return out_p[:B], (hn_p[:, :B, :], cn_p[:, :B, :])


# ---------------- parameter handling ------------------------------------------
def init_params(key):
    """PyTorch-layout LSTM/Linear params (deterministic)."""
    k = HIDDEN_DIM ** -0.5
    lstm = []
    for layer in range(N_LAYERS):
        in_dim = INPUT_DIM if layer == 0 else HIDDEN_DIM
        key, k1, k2, k3, k4 = jax.random.split(key, 5)
        w_ih = jax.random.uniform(k1, (4 * HIDDEN_DIM, in_dim), jnp.float32, -k, k)
        w_hh = jax.random.uniform(k2, (4 * HIDDEN_DIM, HIDDEN_DIM), jnp.float32, -k, k)
        b_ih = jax.random.uniform(k3, (4 * HIDDEN_DIM,), jnp.float32, -k, k)
        b_hh = jax.random.uniform(k4, (4 * HIDDEN_DIM,), jnp.float32, -k, k)
        lstm.append((w_ih, w_hh, b_ih, b_hh))
    key, k5, k6 = jax.random.split(key, 3)
    fc_w = jax.random.uniform(k5, (OUTPUT_DIM, HIDDEN_DIM), jnp.float32, -k, k)
    fc_b = jax.random.uniform(k6, (OUTPUT_DIM,), jnp.float32, -k, k)
    return {"lstm": lstm, "fc_w": fc_w, "fc_b": fc_b}


def pack_params(raw):
    """PyTorch layout -> kernel layout (done ONCE, outside the jitted forward).

    - transpose weights so matmuls are (rows, in) @ (in, 4H)
    - fold b_ih + b_hh into one bias row
    - pre-scale the i/f/o gate columns by 0.5 so the kernel needs a single tanh
      pass per step: sigmoid(z) = 0.5 * tanh(z/2) + 0.5.
    """
    H = HIDDEN_DIM
    col_scale = jnp.concatenate([
        jnp.full((2 * H,), 0.5, jnp.float32),   # i, f  (sigmoid lanes)
        jnp.full((H,), 1.0, jnp.float32),       # g     (tanh lanes)
        jnp.full((H,), 0.5, jnp.float32)])      # o     (sigmoid lanes)
    lstm = []
    for (w_ih, w_hh, b_ih, b_hh) in raw["lstm"]:
        lstm.append((w_ih.T * col_scale[None, :],
                     w_hh.T * col_scale[None, :],
                     ((b_ih + b_hh) * col_scale)[None, :]))
    return {"lstm": lstm,
            "fc_w_t": raw["fc_w"].T,
            "fc_b": raw["fc_b"][None, :]}


# ---------------- pure-JAX reference (no Pallas) -------------------------------
def lstm_net_reference(raw, x, h):
    """nn.LSTM(batch_first, eval) stacked layers + ReLU + Linear."""
    h0_all, c0_all = h
    _, T, _ = x.shape
    H = h0_all.shape[-1]
    inp = x
    h_fin, c_fin = [], []
    for l, (w_ih, w_hh, b_ih, b_hh) in enumerate(raw["lstm"]):
        hp, cp = h0_all[l], c0_all[l]
        outs = []
        for t in range(T):
            z = inp[:, t, :] @ w_ih.T + hp @ w_hh.T + b_ih + b_hh
            i_g = jax.nn.sigmoid(z[:, 0:H])
            f_g = jax.nn.sigmoid(z[:, H:2 * H])
            g_g = jnp.tanh(z[:, 2 * H:3 * H])
            o_g = jax.nn.sigmoid(z[:, 3 * H:4 * H])
            cp = f_g * cp + i_g * g_g
            hp = o_g * jnp.tanh(cp)
            outs.append(hp)
        inp = jnp.stack(outs, axis=1)
        h_fin.append(hp)
        c_fin.append(cp)
    out = jnp.maximum(h_fin[-1], 0.0) @ raw["fc_w"].T + raw["fc_b"]
    return out, (jnp.stack(h_fin), jnp.stack(c_fin))


# ---------------- main ---------------------------------------------------------
if __name__ == "__main__":
    key = jax.random.PRNGKey(0)
    key, kx = jax.random.split(key)
    raw_params = init_params(key)
    packed = pack_params(raw_params)

    x = jax.random.normal(kx, (BATCH, SEQ, INPUT_DIM), jnp.float32)
    # init_hidden(batch_size): zeros
    h0 = jnp.zeros((N_LAYERS, BATCH, HIDDEN_DIM), jnp.float32)
    c0 = jnp.zeros((N_LAYERS, BATCH, HIDDEN_DIM), jnp.float32)

    out, (h_n, c_n) = lstm_net_forward(packed, x, (h0, c0))
    jax.block_until_ready((out, h_n, c_n))

    assert out.shape == (BATCH, OUTPUT_DIM)
    assert h_n.shape == (N_LAYERS, BATCH, HIDDEN_DIM)
    assert c_n.shape == (N_LAYERS, BATCH, HIDDEN_DIM)

    # Correctness vs. pure-JAX reference (loose tolerance: the XLA reference
    # matmuls run at the TPU default matmul precision while the in-kernel
    # matmuls accumulate in f32).
    ref_out, (ref_hn, ref_cn) = lstm_net_reference(raw_params, x, (h0, c0))
    err = max(float(jnp.max(jnp.abs(out - ref_out))),
              float(jnp.max(jnp.abs(h_n - ref_hn))),
              float(jnp.max(jnp.abs(c_n - ref_cn))))
    assert err < 2e-2, f"max abs error vs reference: {err}"

    print("KERNEL_OK")
</pallas_src>

<mosaic_0001>
module attributes {stable_mosaic.version = 11 : i64} {
  func.func @_lstm_net_kernel(%arg0: memref<64x16xf32, #tpu.memory_space<vmem>>, %arg1: memref<16x128xf32, #tpu.memory_space<vmem>>, %arg2: memref<32x128xf32, #tpu.memory_space<vmem>>, %arg3: memref<1x128xf32, #tpu.memory_space<vmem>>, %arg4: memref<32x128xf32, #tpu.memory_space<vmem>>, %arg5: memref<32x128xf32, #tpu.memory_space<vmem>>, %arg6: memref<1x128xf32, #tpu.memory_space<vmem>>, %arg7: memref<2x8x32xf32, #tpu.memory_space<vmem>>, %arg8: memref<2x8x32xf32, #tpu.memory_space<vmem>>, %arg9: memref<32x4xf32, #tpu.memory_space<vmem>>, %arg10: memref<1x4xf32, #tpu.memory_space<vmem>>, %arg11: memref<8x4xf32, #tpu.memory_space<vmem>>, %arg12: memref<2x8x32xf32, #tpu.memory_space<vmem>>, %arg13: memref<2x8x32xf32, #tpu.memory_space<vmem>>) attributes {dimension_semantics = [], scalar_prefetch = 0 : i64, scratch_operands = 0 : i64, tpu.core_type = #tpu.core_type<tc>} {
    %0 = tpu.iota {dimensions = array<i32: 1>} : vector<8x128xi32>
    %c64_i32 = arith.constant 64 : i32
    %1 = vector.broadcast %c64_i32 : i32 to vector<8x128xi32>
    %2 = arith.cmpi sge, %0, %1 : vector<8x128xi32>
    %c96_i32 = arith.constant 96 : i32
    %3 = vector.broadcast %c96_i32 : i32 to vector<8x128xi32>
    %4 = arith.cmpi slt, %0, %3 : vector<8x128xi32>
    %5 = arith.andi %2, %4 : vector<8x128xi1>
    %cst = arith.constant 1.000000e+00 : f32
    %cst_0 = arith.constant 5.000000e-01 : f32
    %6 = vector.broadcast %cst : f32 to vector<8x128xf32>
    %7 = vector.broadcast %cst_0 : f32 to vector<8x128xf32>
    %8 = arith.select %5, %6, %7 : vector<8x128xi1>, vector<8x128xf32>
    %cst_1 = arith.constant 0.000000e+00 : f32
    %cst_2 = arith.constant 5.000000e-01 : f32
    %9 = vector.broadcast %cst_1 : f32 to vector<8x128xf32>
    %10 = vector.broadcast %cst_2 : f32 to vector<8x128xf32>
    %11 = arith.select %5, %9, %10 : vector<8x128xi1>, vector<8x128xf32>
    %c0 = arith.constant 0 : index
    %c0_3 = arith.constant 0 : index
    %12 = vector.load %arg1[%c0, %c0_3] : memref<16x128xf32, #tpu.memory_space<vmem>>, vector<16x128xf32>
    %c0_4 = arith.constant 0 : index
    %c0_5 = arith.constant 0 : index
    %13 = vector.load %arg4[%c0_4, %c0_5] : memref<32x128xf32, #tpu.memory_space<vmem>>, vector<32x128xf32>
    %c0_6 = arith.constant 0 : index
    %c0_7 = arith.constant 0 : index
    %14 = vector.load %arg2[%c0_6, %c0_7] : memref<32x128xf32, #tpu.memory_space<vmem>>, vector<32x128xf32>
    %c0_8 = arith.constant 0 : index
    %c0_9 = arith.constant 0 : index
    %15 = vector.load %arg5[%c0_8, %c0_9] : memref<32x128xf32, #tpu.memory_space<vmem>>, vector<32x128xf32>
    %c0_10 = arith.constant 0 : index
    %c0_11 = arith.constant 0 : index
    %16 = vector.load %arg3[%c0_10, %c0_11] : memref<1x128xf32, #tpu.memory_space<vmem>>, vector<1x128xf32>
    %c0_12 = arith.constant 0 : index
    %c0_13 = arith.constant 0 : index
    %17 = vector.load %arg6[%c0_12, %c0_13] : memref<1x128xf32, #tpu.memory_space<vmem>>, vector<1x128xf32>
    %c0_14 = arith.constant 0 : index
    %c0_15 = arith.constant 0 : index
    %18 = vector.load %arg0[%c0_14, %c0_15] : memref<64x16xf32, #tpu.memory_space<vmem>>, vector<64x16xf32>
    %cst_16 = arith.constant dense<0.000000e+00> : vector<64x128xf32>
    %19 = tpu.matmul %18, %12, %cst_16 {dimension_numbers = #tpu.dot_dimension_numbers<[1], [0], [0], [1], [0, 0, 1, 1], [], []>} : vector<64x16xf32>, vector<16x128xf32>, vector<64x128xf32> -> vector<64x128xf32>
    %20 = vector.broadcast %16 : vector<1x128xf32> to vector<64x128xf32>
    %21 = arith.addf %19, %20 : vector<64x128xf32>
    %c0_17 = arith.constant 0 : index
    %c0_18 = arith.constant 0 : index
    %c0_19 = arith.constant 0 : index
    %22 = vector.load %arg7[%c0_17, %c0_18, %c0_19] : memref<2x8x32xf32, #tpu.memory_space<vmem>>, vector<1x8x32xf32>
    %23 = vector.shape_cast %22 : vector<1x8x32xf32> to vector<8x32xf32>
    %c1 = arith.constant 1 : index
    %c0_20 = arith.constant 0 : index
    %c0_21 = arith.constant 0 : index
    %24 = vector.load %arg7[%c1, %c0_20, %c0_21] : memref<2x8x32xf32, #tpu.memory_space<vmem>>, vector<1x8x32xf32>
    %25 = vector.shape_cast %24 : vector<1x8x32xf32> to vector<8x32xf32>
    %c0_22 = arith.constant 0 : index
    %c0_23 = arith.constant 0 : index
    %c0_24 = arith.constant 0 : index
    %26 = vector.load %arg8[%c0_22, %c0_23, %c0_24] : memref<2x8x32xf32, #tpu.memory_space<vmem>>, vector<1x8x32xf32>
    %27 = vector.shape_cast %26 : vector<1x8x32xf32> to vector<8x32xf32>
    %c1_25 = arith.constant 1 : index
    %c0_26 = arith.constant 0 : index
    %c0_27 = arith.constant 0 : index
    %28 = vector.load %arg8[%c1_25, %c0_26, %c0_27] : memref<2x8x32xf32, #tpu.memory_space<vmem>>, vector<1x8x32xf32>
    %29 = vector.shape_cast %28 : vector<1x8x32xf32> to vector<8x32xf32>
    %30 = vector.extract_strided_slice %21 {offsets = [0, 0], sizes = [8, 128], strides = [1, 1]} : vector<64x128xf32> to vector<8x128xf32>
    %cst_28 = arith.constant dense<0.000000e+00> : vector<8x128xf32>
    %31 = tpu.matmul %23, %14, %cst_28 {dimension_numbers = #tpu.dot_dimension_numbers<[1], [0], [0], [1], [0, 0, 1, 1], [], []>} : vector<8x32xf32>, vector<32x128xf32>, vector<8x128xf32> -> vector<8x128xf32>
    %32 = arith.addf %30, %31 : vector<8x128xf32>
    %33 = math.tanh %32 : vector<8x128xf32>
    %34 = arith.mulf %33, %8 : vector<8x128xf32>
    %35 = arith.addf %34, %11 : vector<8x128xf32>
    %36 = vector.extract_strided_slice %35 {offsets = [0, 0], sizes = [8, 32], strides = [1, 1]} : vector<8x128xf32> to vector<8x32xf32>
    %37 = vector.extract_strided_slice %35 {offsets = [0, 32], sizes = [8, 32], strides = [1, 1]} : vector<8x128xf32> to vector<8x32xf32>
    %38 = vector.extract_strided_slice %35 {offsets = [0, 64], sizes = [8, 32], strides = [1, 1]} : vector<8x128xf32> to vector<8x32xf32>
    %39 = vector.extract_strided_slice %35 {offsets = [0, 96], sizes = [8, 32], strides = [1, 1]} : vector<8x128xf32> to vector<8x32xf32>
    %40 = arith.mulf %37, %27 : vector<8x32xf32>
    %41 = arith.mulf %36, %38 : vector<8x32xf32>
    %42 = arith.addf %40, %41 : vector<8x32xf32>
    %43 = math.tanh %42 : vector<8x32xf32>
    %44 = arith.mulf %39, %43 : vector<8x32xf32>
    %45 = vector.extract_strided_slice %21 {offsets = [8, 0], sizes = [8, 128], strides = [1, 1]} : vector<64x128xf32> to vector<8x128xf32>
    %cst_29 = arith.constant dense<0.000000e+00> : vector<8x128xf32>
    %46 = tpu.matmul %44, %14, %cst_29 {dimension_numbers = #tpu.dot_dimension_numbers<[1], [0], [0], [1], [0, 0, 1, 1], [], []>} : vector<8x32xf32>, vector<32x128xf32>, vector<8x128xf32> -> vector<8x128xf32>
    %47 = arith.addf %45, %46 : vector<8x128xf32>
    %cst_30 = arith.constant dense<0.000000e+00> : vector<8x128xf32>
    %48 = tpu.matmul %44, %13, %cst_30 {dimension_numbers = #tpu.dot_dimension_numbers<[1], [0], [0], [1], [0, 0, 1, 1], [], []>} : vector<8x32xf32>, vector<32x128xf32>, vector<8x128xf32> -> vector<8x128xf32>
    %cst_31 = arith.constant dense<0.000000e+00> : vector<8x128xf32>
    %49 = tpu.matmul %25, %15, %cst_31 {dimension_numbers = #tpu.dot_dimension_numbers<[1], [0], [0], [1], [0, 0, 1, 1], [], []>} : vector<8x32xf32>, vector<32x128xf32>, vector<8x128xf32> -> vector<8x128xf32>
    %50 = arith.addf %48, %49 : vector<8x128xf32>
    %51 = vector.broadcast %17 : vector<1x128xf32> to vector<8x128xf32>
    %52 = arith.addf %50, %51 : vector<8x128xf32>
    %53 = math.tanh %47 : vector<8x128xf32>
    %54 = arith.mulf %53, %8 : vector<8x128xf32>
    %55 = arith.addf %54, %11 : vector<8x128xf32>
    %56 = vector.extract_strided_slice %55 {offsets = [0, 0], sizes = [8, 32], strides = [1, 1]} : vector<8x128xf32> to vector<8x32xf32>
    %57 = vector.extract_strided_slice %55 {offsets = [0, 32], sizes = [8, 32], strides = [1, 1]} : vector<8x128xf32> to vector<8x32xf32>
    %58 = vector.extract_strided_slice %55 {offsets = [0, 64], sizes = [8, 32], strides = [1, 1]} : vector<8x128xf32> to vector<8x32xf32>
    %59 = vector.extract_strided_slice %55 {offsets = [0, 96], sizes = [8, 32], strides = [1, 1]} : vector<8x128xf32> to vector<8x32xf32>
    %60 = arith.mulf %57, %42 : vector<8x32xf32>
    %61 = arith.mulf %56, %58 : vector<8x32xf32>
    %62 = arith.addf %60, %61 : vector<8x32xf32>
    %63 = math.tanh %62 : vector<8x32xf32>
    %64 = arith.mulf %59, %63 : vector<8x32xf32>
    %65 = math.tanh %52 : vector<8x128xf32>
    %66 = arith.mulf %65, %8 : vector<8x128xf32>
    %67 = arith.addf %66, %11 : vector<8x128xf32>
    %68 = vector.extract_strided_slice %67 {offsets = [0, 0], sizes = [8, 32], strides = [1, 1]} : vector<8x128xf32> to vector<8x32xf32>
    %69 = vector.extract_strided_slice %67 {offsets = [0, 32], sizes = [8, 32], strides = [1, 1]} : vector<8x128xf32> to vector<8x32xf32>
    %70 = vector.extract_strided_slice %67 {offsets = [0, 64], sizes = [8, 32], strides = [1, 1]} : vector<8x128xf32> to vector<8x32xf32>
    %71 = vector.extract_strided_slice %67 {offsets = [0, 96], sizes = [8, 32], strides = [1, 1]} : vector<8x128xf32> to vector<8x32xf32>
    %72 = arith.mulf %69, %29 : vector<8x32xf32>
    %73 = arith.mulf %68, %70 : vector<8x32xf32>
    %74 = arith.addf %72, %73 : vector<8x32xf32>
    %75 = math.tanh %74 : vector<8x32xf32>
    %76 = arith.mulf %71, %75 : vector<8x32xf32>
    %77 = vector.extract_strided_slice %21 {offsets = [16, 0], sizes = [8, 128], strides = [1, 1]} : vector<64x128xf32> to vector<8x128xf32>
    %cst_32 = arith.constant dense<0.000000e+00> : vector<8x128xf32>
    %78 = tpu.matmul %64, %14, %cst_32 {dimension_numbers = #tpu.dot_dimension_numbers<[1], [0], [0], [1], [0, 0, 1, 1], [], []>} : vector<8x32xf32>, vector<32x128xf32>, vector<8x128xf32> -> vector<8x128xf32>
    %79 = arith.addf %77, %78 : vector<8x128xf32>
    %cst_33 = arith.constant dense<0.000000e+00> : vector<8x128xf32>
    %80 = tpu.matmul %64, %13, %cst_33 {dimension_numbers = #tpu.dot_dimension_numbers<[1], [0], [0], [1], [0, 0, 1, 1], [], []>} : vector<8x32xf32>, vector<32x128xf32>, vector<8x128xf32> -> vector<8x128xf32>
    %cst_34 = arith.constant dense<0.000000e+00> : vector<8x128xf32>
    %81 = tpu.matmul %76, %15, %cst_34 {dimension_numbers = #tpu.dot_dimension_numbers<[1], [0], [0], [1], [0, 0, 1, 1], [], []>} : vector<8x32xf32>, vector<32x128xf32>, vector<8x128xf32> -> vector<8x128xf32>
    %82 = arith.addf %80, %81 : vector<8x128xf32>
    %83 = vector.broadcast %17 : vector<1x128xf32> to vector<8x128xf32>
    %84 = arith.addf %82, %83 : vector<8x128xf32>
    %85 = math.tanh %79 : vector<8x128xf32>
    %86 = arith.mulf %85, %8 : vector<8x128xf32>
    %87 = arith.addf %86, %11 : vector<8x128xf32>
    %88 = vector.extract_strided_slice %87 {offsets = [0, 0], sizes = [8, 32], strides = [1, 1]} : vector<8x128xf32> to vector<8x32xf32>
    %89 = vector.extract_strided_slice %87 {offsets = [0, 32], sizes = [8, 32], strides = [1, 1]} : vector<8x128xf32> to vector<8x32xf32>
    %90 = vector.extract_strided_slice %87 {offsets = [0, 64], sizes = [8, 32], strides = [1, 1]} : vector<8x128xf32> to vector<8x32xf32>
    %91 = vector.extract_strided_slice %87 {offsets = [0, 96], sizes = [8, 32], strides = [1, 1]} : vector<8x128xf32> to vector<8x32xf32>
    %92 = arith.mulf %89, %62 : vector<8x32xf32>
    %93 = arith.mulf %88, %90 : vector<8x32xf32>
    %94 = arith.addf %92, %93 : vector<8x32xf32>
    %95 = math.tanh %94 : vector<8x32xf32>
    %96 = arith.mulf %91, %95 : vector<8x32xf32>
    %97 = math.tanh %84 : vector<8x128xf32>
    %98 = arith.mulf %97, %8 : vector<8x128xf32>
    %99 = arith.addf %98, %11 : vector<8x128xf32>
    %100 = vector.extract_strided_slice %99 {offsets = [0, 0], sizes = [8, 32], strides = [1, 1]} : vector<8x128xf32> to vector<8x32xf32>
    %101 = vector.extract_strided_slice %99 {offsets = [0, 32], sizes = [8, 32], strides = [1, 1]} : vector<8x128xf32> to vector<8x32xf32>
    %102 = vector.extract_strided_slice %99 {offsets = [0, 64], sizes = [8, 32], strides = [1, 1]} : vector<8x128xf32> to vector<8x32xf32>
    %103 = vector.extract_strided_slice %99 {offsets = [0, 96], sizes = [8, 32], strides = [1, 1]} : vector<8x128xf32> to vector<8x32xf32>
    %104 = arith.mulf %101, %74 : vector<8x32xf32>
    %105 = arith.mulf %100, %102 : vector<8x32xf32>
    %106 = arith.addf %104, %105 : vector<8x32xf32>
    %107 = math.tanh %106 : vector<8x32xf32>
    %108 = arith.mulf %103, %107 : vector<8x32xf32>
    %109 = vector.extract_strided_slice %21 {offsets = [24, 0], sizes = [8, 128], strides = [1, 1]} : vector<64x128xf32> to vector<8x128xf32>
    %cst_35 = arith.constant dense<0.000000e+00> : vector<8x128xf32>
    %110 = tpu.matmul %96, %14, %cst_35 {dimension_numbers = #tpu.dot_dimension_numbers<[1], [0], [0], [1], [0, 0, 1, 1], [], []>} : vector<8x32xf32>, vector<32x128xf32>, vector<8x128xf32> -> vector<8x128xf32>
    %111 = arith.addf %109, %110 : vector<8x128xf32>
    %cst_36 = arith.constant dense<0.000000e+00> : vector<8x128xf32>
    %112 = tpu.matmul %96, %13, %cst_36 {dimension_numbers = #tpu.dot_dimension_numbers<[1], [0], [0], [1], [0, 0, 1, 1], [], []>} : vector<8x32xf32>, vector<32x128xf32>, vector<8x128xf32> -> vector<8x128xf32>
    %cst_37 = arith.constant dense<0.000000e+00> : vector<8x128xf32>
    %113 = tpu.matmul %108, %15, %cst_37 {dimension_numbers = #tpu.dot_dimension_numbers<[1], [0], [0], [1], [0, 0, 1, 1], [], []>} : vector<8x32xf32>, vector<32x128xf32>, vector<8x128xf32> -> vector<8x128xf32>
    %114 = arith.addf %112, %113 : vector<8x128xf32>
    %115 = vector.broadcast %17 : vector<1x128xf32> to vector<8x128xf32>
    %116 = arith.addf %114, %115 : vector<8x128xf32>
    %117 = math.tanh %111 : vector<8x128xf32>
    %118 = arith.mulf %117, %8 : vector<8x128xf32>
    %119 = arith.addf %118, %11 : vector<8x128xf32>
    %120 = vector.extract_strided_slice %119 {offsets = [0, 0], sizes = [8, 32], strides = [1, 1]} : vector<8x128xf32> to vector<8x32xf32>
    %121 = vector.extract_strided_slice %119 {offsets = [0, 32], sizes = [8, 32], strides = [1, 1]} : vector<8x128xf32> to vector<8x32xf32>
    %122 = vector.extract_strided_slice %119 {offsets = [0, 64], sizes = [8, 32], strides = [1, 1]} : vector<8x128xf32> to vector<8x32xf32>
    %123 = vector.extract_strided_slice %119 {offsets = [0, 96], sizes = [8, 32], strides = [1, 1]} : vector<8x128xf32> to vector<8x32xf32>
    %124 = arith.mulf %121, %94 : vector<8x32xf32>
    %125 = arith.mulf %120, %122 : vector<8x32xf32>
    %126 = arith.addf %124, %125 : vector<8x32xf32>
    %127 = math.tanh %126 : vector<8x32xf32>
    %128 = arith.mulf %123, %127 : vector<8x32xf32>
    %129 = math.tanh %116 : vector<8x128xf32>
    %130 = arith.mulf %129, %8 : vector<8x128xf32>
    %131 = arith.addf %130, %11 : vector<8x128xf32>
    %132 = vector.extract_strided_slice %131 {offsets = [0, 0], sizes = [8, 32], strides = [1, 1]} : vector<8x128xf32> to vector<8x32xf32>
    %133 = vector.extract_strided_slice %131 {offsets = [0, 32], sizes = [8, 32], strides = [1, 1]} : vector<8x128xf32> to vector<8x32xf32>
    %134 = vector.extract_strided_slice %131 {offsets = [0, 64], sizes = [8, 32], strides = [1, 1]} : vector<8x128xf32> to vector<8x32xf32>
    %135 = vector.extract_strided_slice %131 {offsets = [0, 96], sizes = [8, 32], strides = [1, 1]} : vector<8x128xf32> to vector<8x32xf32>
    %136 = arith.mulf %133, %106 : vector<8x32xf32>
    %137 = arith.mulf %132, %134 : vector<8x32xf32>
    %138 = arith.addf %136, %137 : vector<8x32xf32>
    %139 = math.tanh %138 : vector<8x32xf32>
    %140 = arith.mulf %135, %139 : vector<8x32xf32>
    %141 = vector.extract_strided_slice %21 {offsets = [32, 0], sizes = [8, 128], strides = [1, 1]} : vector<64x128xf32> to vector<8x128xf32>
    %cst_38 = arith.constant dense<0.000000e+00> : vector<8x128xf32>
    %142 = tpu.matmul %128, %14, %cst_38 {dimension_numbers = #tpu.dot_dimension_numbers<[1], [0], [0], [1], [0, 0, 1, 1], [], []>} : vector<8x32xf32>, vector<32x128xf32>, vector<8x128xf32> -> vector<8x128xf32>
    %143 = arith.addf %141, %142 : vector<8x128xf32>
    %cst_39 = arith.constant dense<0.000000e+00> : vector<8x128xf32>
    %144 = tpu.matmul %128, %13, %cst_39 {dimension_numbers = #tpu.dot_dimension_numbers<[1], [0], [0], [1], [0, 0, 1, 1], [], []>} : vector<8x32xf32>, vector<32x128xf32>, vector<8x128xf32> -> vector<8x128xf32>
    %cst_40 = arith.constant dense<0.000000e+00> : vector<8x128xf32>
    %145 = tpu.matmul %140, %15, %cst_40 {dimension_numbers = #tpu.dot_dimension_numbers<[1], [0], [0], [1], [0, 0, 1, 1], [], []>} : vector<8x32xf32>, vector<32x128xf32>, vector<8x128xf32> -> vector<8x128xf32>
    %146 = arith.addf %144, %145 : vector<8x128xf32>
    %147 = vector.broadcast %17 : vector<1x128xf32> to vector<8x128xf32>
    %148 = arith.addf %146, %147 : vector<8x128xf32>
    %149 = math.tanh %143 : vector<8x128xf32>
    %150 = arith.mulf %149, %8 : vector<8x128xf32>
    %151 = arith.addf %150, %11 : vector<8x128xf32>
    %152 = vector.extract_strided_slice %151 {offsets = [0, 0], sizes = [8, 32], strides = [1, 1]} : vector<8x128xf32> to vector<8x32xf32>
    %153 = vector.extract_strided_slice %151 {offsets = [0, 32], sizes = [8, 32], strides = [1, 1]} : vector<8x128xf32> to vector<8x32xf32>
    %154 = vector.extract_strided_slice %151 {offsets = [0, 64], sizes = [8, 32], strides = [1, 1]} : vector<8x128xf32> to vector<8x32xf32>
    %155 = vector.extract_strided_slice %151 {offsets = [0, 96], sizes = [8, 32], strides = [1, 1]} : vector<8x128xf32> to vector<8x32xf32>
    %156 = arith.mulf %153, %126 : vector<8x32xf32>
    %157 = arith.mulf %152, %154 : vector<8x32xf32>
    %158 = arith.addf %156, %157 : vector<8x32xf32>
    %159 = math.tanh %158 : vector<8x32xf32>
    %160 = arith.mulf %155, %159 : vector<8x32xf32>
    %161 = math.tanh %148 : vector<8x128xf32>
    %162 = arith.mulf %161, %8 : vector<8x128xf32>
    %163 = arith.addf %162, %11 : vector<8x128xf32>
    %164 = vector.extract_strided_slice %163 {offsets = [0, 0], sizes = [8, 32], strides = [1, 1]} : vector<8x128xf32> to vector<8x32xf32>
    %165 = vector.extract_strided_slice %163 {offsets = [0, 32], sizes = [8, 32], strides = [1, 1]} : vector<8x128xf32> to vector<8x32xf32>
    %166 = vector.extract_strided_slice %163 {offsets = [0, 64], sizes = [8, 32], strides = [1, 1]} : vector<8x128xf32> to vector<8x32xf32>
    %167 = vector.extract_strided_slice %163 {offsets = [0, 96], sizes = [8, 32], strides = [1, 1]} : vector<8x128xf32> to vector<8x32xf32>
    %168 = arith.mulf %165, %138 : vector<8x32xf32>
    %169 = arith.mulf %164, %166 : vector<8x32xf32>
    %170 = arith.addf %168, %169 : vector<8x32xf32>
    %171 = math.tanh %170 : vector<8x32xf32>
    %172 = arith.mulf %167, %171 : vector<8x32xf32>
    %173 = vector.extract_strided_slice %21 {offsets = [40, 0], sizes = [8, 128], strides = [1, 1]} : vector<64x128xf32> to vector<8x128xf32>
    %cst_41 = arith.constant dense<0.000000e+00> : vector<8x128xf32>
    %174 = tpu.matmul %160, %14, %cst_41 {dimension_numbers = #tpu.dot_dimension_numbers<[1], [0], [0], [1], [0, 0, 1, 1], [], []>} : vector<8x32xf32>, vector<32x128xf32>, vector<8x128xf32> -> vector<8x128xf32>
    %175 = arith.addf %173, %174 : vector<8x128xf32>
    %cst_42 = arith.constant dense<0.000000e+00> : vector<8x128xf32>
    %176 = tpu.matmul %160, %13, %cst_42 {dimension_numbers = #tpu.dot_dimension_numbers<[1], [0], [0], [1], [0, 0, 1, 1], [], []>} : vector<8x32xf32>, vector<32x128xf32>, vector<8x128xf32> -> vector<8x128xf32>
    %cst_43 = arith.constant dense<0.000000e+00> : vector<8x128xf32>
    %177 = tpu.matmul %172, %15, %cst_43 {dimension_numbers = #tpu.dot_dimension_numbers<[1], [0], [0], [1], [0, 0, 1, 1], [], []>} : vector<8x32xf32>, vector<32x128xf32>, vector<8x128xf32> -> vector<8x128xf32>
    %178 = arith.addf %176, %177 : vector<8x128xf32>
    %179 = vector.broadcast %17 : vector<1x128xf32> to vector<8x128xf32>
    %180 = arith.addf %178, %179 : vector<8x128xf32>
    %181 = math.tanh %175 : vector<8x128xf32>
    %182 = arith.mulf %181, %8 : vector<8x128xf32>
    %183 = arith.addf %182, %11 : vector<8x128xf32>
    %184 = vector.extract_strided_slice %183 {offsets = [0, 0], sizes = [8, 32], strides = [1, 1]} : vector<8x128xf32> to vector<8x32xf32>
    %185 = vector.extract_strided_slice %183 {offsets = [0, 32], sizes = [8, 32], strides = [1, 1]} : vector<8x128xf32> to vector<8x32xf32>
    %186 = vector.extract_strided_slice %183 {offsets = [0, 64], sizes = [8, 32], strides = [1, 1]} : vector<8x128xf32> to vector<8x32xf32>
    %187 = vector.extract_strided_slice %183 {offsets = [0, 96], sizes = [8, 32], strides = [1, 1]} : vector<8x128xf32> to vector<8x32xf32>
    %188 = arith.mulf %185, %158 : vector<8x32xf32>
    %189 = arith.mulf %184, %186 : vector<8x32xf32>
    %190 = arith.addf %188, %189 : vector<8x32xf32>
    %191 = math.tanh %190 : vector<8x32xf32>
    %192 = arith.mulf %187, %191 : vector<8x32xf32>
    %193 = math.tanh %180 : vector<8x128xf32>
    %194 = arith.mulf %193, %8 : vector<8x128xf32>
    %195 = arith.addf %194, %11 : vector<8x128xf32>
    %196 = vector.extract_strided_slice %195 {offsets = [0, 0], sizes = [8, 32], strides = [1, 1]} : vector<8x128xf32> to vector<8x32xf32>
    %197 = vector.extract_strided_slice %195 {offsets = [0, 32], sizes = [8, 32], strides = [1, 1]} : vector<8x128xf32> to vector<8x32xf32>
    %198 = vector.extract_strided_slice %195 {offsets = [0, 64], sizes = [8, 32], strides = [1, 1]} : vector<8x128xf32> to vector<8x32xf32>
    %199 = vector.extract_strided_slice %195 {offsets = [0, 96], sizes = [8, 32], strides = [1, 1]} : vector<8x128xf32> to vector<8x32xf32>
    %200 = arith.mulf %197, %170 : vector<8x32xf32>
    %201 = arith.mulf %196, %198 : vector<8x32xf32>
    %202 = arith.addf %200, %201 : vector<8x32xf32>
    %203 = math.tanh %202 : vector<8x32xf32>
    %204 = arith.mulf %199, %203 : vector<8x32xf32>
    %205 = vector.extract_strided_slice %21 {offsets = [48, 0], sizes = [8, 128], strides = [1, 1]} : vector<64x128xf32> to vector<8x128xf32>
    %cst_44 = arith.constant dense<0.000000e+00> : vector<8x128xf32>
    %206 = tpu.matmul %192, %14, %cst_44 {dimension_numbers = #tpu.dot_dimension_numbers<[1], [0], [0], [1], [0, 0, 1, 1], [], []>} : vector<8x32xf32>, vector<32x128xf32>, vector<8x128xf32> -> vector<8x128xf32>
    %207 = arith.addf %205, %206 : vector<8x128xf32>
    %cst_45 = arith.constant dense<0.000000e+00> : vector<8x128xf32>
    %208 = tpu.matmul %192, %13, %cst_45 {dimension_numbers = #tpu.dot_dimension_numbers<[1], [0], [0], [1], [0, 0, 1, 1], [], []>} : vector<8x32xf32>, vector<32x128xf32>, vector<8x128xf32> -> vector<8x128xf32>
    %cst_46 = arith.constant dense<0.000000e+00> : vector<8x128xf32>
    %209 = tpu.matmul %204, %15, %cst_46 {dimension_numbers = #tpu.dot_dimension_numbers<[1], [0], [0], [1], [0, 0, 1, 1], [], []>} : vector<8x32xf32>, vector<32x128xf32>, vector<8x128xf32> -> vector<8x128xf32>
    %210 = arith.addf %208, %209 : vector<8x128xf32>
    %211 = vector.broadcast %17 : vector<1x128xf32> to vector<8x128xf32>
    %212 = arith.addf %210, %211 : vector<8x128xf32>
    %213 = math.tanh %207 : vector<8x128xf32>
    %214 = arith.mulf %213, %8 : vector<8x128xf32>
    %215 = arith.addf %214, %11 : vector<8x128xf32>
    %216 = vector.extract_strided_slice %215 {offsets = [0, 0], sizes = [8, 32], strides = [1, 1]} : vector<8x128xf32> to vector<8x32xf32>
    %217 = vector.extract_strided_slice %215 {offsets = [0, 32], sizes = [8, 32], strides = [1, 1]} : vector<8x128xf32> to vector<8x32xf32>
    %218 = vector.extract_strided_slice %215 {offsets = [0, 64], sizes = [8, 32], strides = [1, 1]} : vector<8x128xf32> to vector<8x32xf32>
    %219 = vector.extract_strided_slice %215 {offsets = [0, 96], sizes = [8, 32], strides = [1, 1]} : vector<8x128xf32> to vector<8x32xf32>
    %220 = arith.mulf %217, %190 : vector<8x32xf32>
    %221 = arith.mulf %216, %218 : vector<8x32xf32>
    %222 = arith.addf %220, %221 : vector<8x32xf32>
    %223 = math.tanh %222 : vector<8x32xf32>
    %224 = arith.mulf %219, %223 : vector<8x32xf32>
    %225 = math.tanh %212 : vector<8x128xf32>
    %226 = arith.mulf %225, %8 : vector<8x128xf32>
    %227 = arith.addf %226, %11 : vector<8x128xf32>
    %228 = vector.extract_strided_slice %227 {offsets = [0, 0], sizes = [8, 32], strides = [1, 1]} : vector<8x128xf32> to vector<8x32xf32>
    %229 = vector.extract_strided_slice %227 {offsets = [0, 32], sizes = [8, 32], strides = [1, 1]} : vector<8x128xf32> to vector<8x32xf32>
    %230 = vector.extract_strided_slice %227 {offsets = [0, 64], sizes = [8, 32], strides = [1, 1]} : vector<8x128xf32> to vector<8x32xf32>
    %231 = vector.extract_strided_slice %227 {offsets = [0, 96], sizes = [8, 32], strides = [1, 1]} : vector<8x128xf32> to vector<8x32xf32>
    %232 = arith.mulf %229, %202 : vector<8x32xf32>
    %233 = arith.mulf %228, %230 : vector<8x32xf32>
    %234 = arith.addf %232, %233 : vector<8x32xf32>
    %235 = math.tanh %234 : vector<8x32xf32>
    %236 = arith.mulf %231, %235 : vector<8x32xf32>
    %237 = vector.extract_strided_slice %21 {offsets = [56, 0], sizes = [8, 128], strides = [1, 1]} : vector<64x128xf32> to vector<8x128xf32>
    %cst_47 = arith.constant dense<0.000000e+00> : vector<8x128xf32>
    %238 = tpu.matmul %224, %14, %cst_47 {dimension_numbers = #tpu.dot_dimension_numbers<[1], [0], [0], [1], [0, 0, 1, 1], [], []>} : vector<8x32xf32>, vector<32x128xf32>, vector<8x128xf32> -> vector<8x128xf32>
    %239 = arith.addf %237, %238 : vector<8x128xf32>
    %cst_48 = arith.constant dense<0.000000e+00> : vector<8x128xf32>
    %240 = tpu.matmul %224, %13, %cst_48 {dimension_numbers = #tpu.dot_dimension_numbers<[1], [0], [0], [1], [0, 0, 1, 1], [], []>} : vector<8x32xf32>, vector<32x128xf32>, vector<8x128xf32> -> vector<8x128xf32>
    %cst_49 = arith.constant dense<0.000000e+00> : vector<8x128xf32>
    %241 = tpu.matmul %236, %15, %cst_49 {dimension_numbers = #tpu.dot_dimension_numbers<[1], [0], [0], [1], [0, 0, 1, 1], [], []>} : vector<8x32xf32>, vector<32x128xf32>, vector<8x128xf32> -> vector<8x128xf32>
    %242 = arith.addf %240, %241 : vector<8x128xf32>
    %243 = vector.broadcast %17 : vector<1x128xf32> to vector<8x128xf32>
    %244 = arith.addf %242, %243 : vector<8x128xf32>
    %245 = math.tanh %239 : vector<8x128xf32>
    %246 = arith.mulf %245, %8 : vector<8x128xf32>
    %247 = arith.addf %246, %11 : vector<8x128xf32>
    %248 = vector.extract_strided_slice %247 {offsets = [0, 0], sizes = [8, 32], strides = [1, 1]} : vector<8x128xf32> to vector<8x32xf32>
    %249 = vector.extract_strided_slice %247 {offsets = [0, 32], sizes = [8, 32], strides = [1, 1]} : vector<8x128xf32> to vector<8x32xf32>
    %250 = vector.extract_strided_slice %247 {offsets = [0, 64], sizes = [8, 32], strides = [1, 1]} : vector<8x128xf32> to vector<8x32xf32>
    %251 = vector.extract_strided_slice %247 {offsets = [0, 96], sizes = [8, 32], strides = [1, 1]} : vector<8x128xf32> to vector<8x32xf32>
    %252 = arith.mulf %249, %222 : vector<8x32xf32>
    %253 = arith.mulf %248, %250 : vector<8x32xf32>
    %254 = arith.addf %252, %253 : vector<8x32xf32>
    %255 = math.tanh %254 : vector<8x32xf32>
    %256 = arith.mulf %251, %255 : vector<8x32xf32>
    %257 = math.tanh %244 : vector<8x128xf32>
    %258 = arith.mulf %257, %8 : vector<8x128xf32>
    %259 = arith.addf %258, %11 : vector<8x128xf32>
    %260 = vector.extract_strided_slice %259 {offsets = [0, 0], sizes = [8, 32], strides = [1, 1]} : vector<8x128xf32> to vector<8x32xf32>
    %261 = vector.extract_strided_slice %259 {offsets = [0, 32], sizes = [8, 32], strides = [1, 1]} : vector<8x128xf32> to vector<8x32xf32>
    %262 = vector.extract_strided_slice %259 {offsets = [0, 64], sizes = [8, 32], strides = [1, 1]} : vector<8x128xf32> to vector<8x32xf32>
    %263 = vector.extract_strided_slice %259 {offsets = [0, 96], sizes = [8, 32], strides = [1, 1]} : vector<8x128xf32> to vector<8x32xf32>
    %264 = arith.mulf %261, %234 : vector<8x32xf32>
    %265 = arith.mulf %260, %262 : vector<8x32xf32>
    %266 = arith.addf %264, %265 : vector<8x32xf32>
    %267 = math.tanh %266 : vector<8x32xf32>
    %268 = arith.mulf %263, %267 : vector<8x32xf32>
    %cst_50 = arith.constant dense<0.000000e+00> : vector<8x128xf32>
    %269 = tpu.matmul %256, %13, %cst_50 {dimension_numbers = #tpu.dot_dimension_numbers<[1], [0], [0], [1], [0, 0, 1, 1], [], []>} : vector<8x32xf32>, vector<32x128xf32>, vector<8x128xf32> -> vector<8x128xf32>
    %cst_51 = arith.constant dense<0.000000e+00> : vector<8x128xf32>
    %270 = tpu.matmul %268, %15, %cst_51 {dimension_numbers = #tpu.dot_dimension_numbers<[1], [0], [0], [1], [0, 0, 1, 1], [], []>} : vector<8x32xf32>, vector<32x128xf32>, vector<8x128xf32> -> vector<8x128xf32>
    %271 = arith.addf %269, %270 : vector<8x128xf32>
    %272 = vector.broadcast %17 : vector<1x128xf32> to vector<8x128xf32>
    %273 = arith.addf %271, %272 : vector<8x128xf32>
    %274 = math.tanh %273 : vector<8x128xf32>
    %275 = arith.mulf %274, %8 : vector<8x128xf32>
    %276 = arith.addf %275, %11 : vector<8x128xf32>
    %277 = vector.extract_strided_slice %276 {offsets = [0, 0], sizes = [8, 32], strides = [1, 1]} : vector<8x128xf32> to vector<8x32xf32>
    %278 = vector.extract_strided_slice %276 {offsets = [0, 32], sizes = [8, 32], strides = [1, 1]} : vector<8x128xf32> to vector<8x32xf32>
    %279 = vector.extract_strided_slice %276 {offsets = [0, 64], sizes = [8, 32], strides = [1, 1]} : vector<8x128xf32> to vector<8x32xf32>
    %280 = vector.extract_strided_slice %276 {offsets = [0, 96], sizes = [8, 32], strides = [1, 1]} : vector<8x128xf32> to vector<8x32xf32>
    %281 = arith.mulf %278, %266 : vector<8x32xf32>
    %282 = arith.mulf %277, %279 : vector<8x32xf32>
    %283 = arith.addf %281, %282 : vector<8x32xf32>
    %284 = math.tanh %283 : vector<8x32xf32>
    %285 = arith.mulf %280, %284 : vector<8x32xf32>
    %c0_52 = arith.constant 0 : index
    %c0_53 = arith.constant 0 : index
    %c0_54 = arith.constant 0 : index
    %286 = vector.load %arg12[%c0_52, %c0_53, %c0_54] : memref<2x8x32xf32, #tpu.memory_space<vmem>>, vector<1x8x32xf32>
    %287 = vector.shape_cast %286 : vector<1x8x32xf32> to vector<8x32xf32>
    %288 = vector.shape_cast %256 : vector<8x32xf32> to vector<1x8x32xf32>
    tpu.vector_store %arg12[%c0_52, %c0_53, %c0_54], %288 {strides = array<i32>} : memref<2x8x32xf32, #tpu.memory_space<vmem>>, vector<1x8x32xf32>,
    %c0_55 = arith.constant 0 : index
    %c0_56 = arith.constant 0 : index
    %c0_57 = arith.constant 0 : index
    %289 = vector.load %arg13[%c0_55, %c0_56, %c0_57] : memref<2x8x32xf32, #tpu.memory_space<vmem>>, vector<1x8x32xf32>
    %290 = vector.shape_cast %289 : vector<1x8x32xf32> to vector<8x32xf32>
    %291 = vector.shape_cast %254 : vector<8x32xf32> to vector<1x8x32xf32>
    tpu.vector_store %arg13[%c0_55, %c0_56, %c0_57], %291 {strides = array<i32>} : memref<2x8x32xf32, #tpu.memory_space<vmem>>, vector<1x8x32xf32>,
    %c1_58 = arith.constant 1 : index
    %c0_59 = arith.constant 0 : index
    %c0_60 = arith.constant 0 : index
    %292 = vector.load %arg12[%c1_58, %c0_59, %c0_60] : memref<2x8x32xf32, #tpu.memory_space<vmem>>, vector<1x8x32xf32>
    %293 = vector.shape_cast %292 : vector<1x8x32xf32> to vector<8x32xf32>
    %294 = vector.shape_cast %285 : vector<8x32xf32> to vector<1x8x32xf32>
    tpu.vector_store %arg12[%c1_58, %c0_59, %c0_60], %294 {strides = array<i32>} : memref<2x8x32xf32, #tpu.memory_space<vmem>>, vector<1x8x32xf32>,
    %c1_61 = arith.constant 1 : index
    %c0_62 = arith.constant 0 : index
    %c0_63 = arith.constant 0 : index
    %295 = vector.load %arg13[%c1_61, %c0_62, %c0_63] : memref<2x8x32xf32, #tpu.memory_space<vmem>>, vector<1x8x32xf32>
    %296 = vector.shape_cast %295 : vector<1x8x32xf32> to vector<8x32xf32>
    %297 = vector.shape_cast %283 : vector<8x32xf32> to vector<1x8x32xf32>
    tpu.vector_store %arg13[%c1_61, %c0_62, %c0_63], %297 {strides = array<i32>} : memref<2x8x32xf32, #tpu.memory_space<vmem>>, vector<1x8x32xf32>,
    %cst_64 = arith.constant 0.000000e+00 : f32
    %298 = vector.broadcast %cst_64 : f32 to vector<8x32xf32>
    %299 = arith.maximumf %285, %298 : vector<8x32xf32>
    %c0_65 = arith.constant 0 : index
    %c0_66 = arith.constant 0 : index
    %300 = vector.load %arg9[%c0_65, %c0_66] : memref<32x4xf32, #tpu.memory_space<vmem>>, vector<32x4xf32>
    %cst_67 = arith.constant dense<0.000000e+00> : vector<8x4xf32>
    %301 = tpu.matmul %299, %300, %cst_67 {dimension_numbers = #tpu.dot_dimension_numbers<[1], [0], [0], [1], [0, 0, 1, 1], [], []>} : vector<8x32xf32>, vector<32x4xf32>, vector<8x4xf32> -> vector<8x4xf32>
    %c0_68 = arith.constant 0 : index
    %c0_69 = arith.constant 0 : index
    %302 = vector.load %arg10[%c0_68, %c0_69] : memref<1x4xf32, #tpu.memory_space<vmem>>, vector<1x4xf32>
    %303 = vector.broadcast %302 : vector<1x4xf32> to vector<8x4xf32>
    %304 = arith.addf %301, %303 : vector<8x4xf32>
    %c0_70 = arith.constant 0 : index
    %c0_71 = arith.constant 0 : index
    %305 = vector.load %arg11[%c0_70, %c0_71] : memref<8x4xf32, #tpu.memory_space<vmem>>, vector<8x4xf32>
    tpu.vector_store %arg11[%c0_70, %c0_71], %304 {strides = array<i32>} : memref<8x4xf32, #tpu.memory_space<vmem>>, vector<8x4xf32>,
    return
  }
}

</mosaic_0001>

<bundles_post_ra>
// kernel: lstm_net_forward.1
= control target key start
LH: loop header
LB: loop body
LE: loop exit
PB: predicated region body
PF: predicated region fallthrough
CT: control target
= control target key end

     0   :  { %vm75_vm0 = vcmask 130048   ;;  %vm147_vm1 = vcmask 261120   ;;  %v41_v9 = vlaneseq  ;;  %v1231_v15 = vmov 0.5   ;;  %s1233_s26 = smov 32   ;;  %s1711_s2 = inlined_call_operand.vmem [shape: f32[32,128], index: 2, kind: input, shape index: {}]   ;;  %s1712_s1 = inlined_call_operand.vmem [shape: f32[16,128], index: 1, kind: input, shape index: {}]   ;;  %s1713_s0 = inlined_call_operand.vmem [shape: f32[64,16], index: 0, kind: input, shape index: {}]   ;;  %s1714_s3 = inlined_call_operand.vmem [shape: f32[1,128], index: 3, kind: input, shape index: {}]   ;;  %s1715_s7 = inlined_call_operand.vmem [shape: f32[2,8,32], index: 7, kind: input, shape index: {}]   ;;  %s1716_s8 = inlined_call_operand.vmem [shape: f32[2,8,32], index: 8, kind: input, shape index: {}]   ;;  %s1717_s5 = inlined_call_operand.vmem [shape: f32[32,128], index: 5, kind: input, shape index: {}]   ;;  %s1718_s4 = inlined_call_operand.vmem [shape: f32[32,128], index: 4, kind: input, shape index: {}]   ;;  %s1719_s6 = inlined_call_operand.vmem [shape: f32[1,128], index: 6, kind: input, shape index: {}]   ;;  %s1720_s12 = inlined_call_operand.vmem [shape: f32[2,8,32], index: 12, kind: output, shape index: {1}]   ;;  %s1721_s13 = inlined_call_operand.vmem [shape: f32[2,8,32], index: 13, kind: output, shape index: {2}]   ;;  %s1722_s9 = inlined_call_operand.vmem [shape: f32[32,4], index: 9, kind: input, shape index: {}]   ;;  %s1723_s10 = inlined_call_operand.vmem [shape: f32[1,4], index: 10, kind: input, shape index: {}]   ;;  %s1724_s11 = inlined_call_operand.vmem [shape: f32[8,4], index: 11, kind: output, shape index: {0}]  }
   0x1   :  { %v1308_v0 = vld [vmem:[%s1711_s2 + $0x18] sm:$0xff]  ;;  %v49_v1 = vld [vmem:[%s1712_s1 + $0x8] sm:$0xff]  ;;  %v1316_v2 = vld [vmem:[%s1711_s2 + $0x10] sm:$0xff]  ;;  %vm1109_vm5 = vcmask 31744  }
   0x2   :  { %163 = vmatpush.msra.mxu1 %v1308_v0  ;;  %114 = vmatpush.msra.mxu0 %v49_v1  ;;  %v48_v3 = vld [vmem:[%s1712_s1] sm:$0xff]  ;;  %v1328_v5 = vld [vmem:[%s1711_s2 + $0x8] sm:$0xff]  ;;  %v42_v12 = vand.u32 127, %v41_v9  ;;  %v1376_v29 = vld [vmem:[%s1717_s5 + $0x18] sm:$0xff] }
   0x3   :  { %v64_v4 = vld [vmem:[%s1713_s0] sm:$0xff]  ;;  %213 = vmatpush.msra.mxu2 %v1308_v0  ;;  %v1381_v30 = vld [vmem:[%s1717_s5 + $0x10] sm:$0xff]  ;;  %237 = vmatpush.msra.mxu3 %v1376_v29  ;;  %v1387_v31 = vld [vmem:[%s1718_s4 + $0x18] sm:$0xff] }
   0x4   :  { %164 = vmatpush.msra.mxu1 %v1316_v2  ;;  %115 = vmatpush.msra.mxu0 %v48_v3  ;;  %v1336_v6 = vld [vmem:[%s1711_s2] sm:$0xff]  ;;  %vm43_vm2 = vcmp.ge.s32.totalorder %v42_v12, 64  ;;  %vm44_vm3 = vcmp.lt.s32.totalorder %v42_v12, 96  ;;  %v1392_v32 = vld [vmem:[%s1717_s5 + $0x8] sm:$0xff]  ;;  %v1398_v33 = vld [vmem:[%s1718_s4 + $0x10] sm:$0xff]  ;;  %s1234_s2 = smov 96  }
   0x5   :  { %1123 = vmatmul.msk.f32.vlgmr.msra.gmra.mxu0 %vm75_vm0, %v64_v4  ;;  %214 = vmatpush.msra.mxu2 %v1316_v2  ;;  %v141_v7 = vld [vmem:[%s1715_s7] sm:$0xff]  ;;  %vm45_vm4 = vmand %vm43_vm2, %vm44_vm3  ;;  %v1404_v34 = vld [vmem:[%s1718_s4 + $0x8] sm:$0xff] }
   0x6   :  { %165 = vmatpush.msra.mxu1 %v1328_v5  ;;  %v1354_v8 = vld [vmem:[%s1714_s3] ss:$0 sm:$0xff]  ;;  %v1357_v16 = vsel %vm45_vm4, 1.0, %v1231_v15  ;;  %v1359_v18 = vsel %vm45_vm4, 0.0, %v1231_v15  ;;  %s1232_s3 = smov 64   ;;  %238 = vmatpush.msra.mxu3 %v1381_v30  ;;  %v1131_v36 = vld [vmem:[%s1715_s7 + $0x8] sm:$0xff] }
   0x7   :  { %215 = vmatpush.msra.mxu2 %v1328_v5  ;;  %v144_v21 = vld [vmem:[%s1716_s8] sm:$0xff]  ;;  %v65_v40 = vld [vmem:[%s1713_s0 + $0x8] sm:$0xff] }
   0x8   :  { %166 = vmatpush.msra.mxu1 %v1336_v6  ;;  %v1409_v35 = vld [vmem:[%s1717_s5] sm:$0xff]  ;;  %239 = vmatpush.msra.mxu3 %v1392_v32  ;;  %v1132_v41 = vld [vmem:[%s1716_s8 + $0x8] sm:$0xff] }
   0x9   :  { %1133 = vmatmul.msk.f32.vlgmr.msra.gmra.mxu1 %vm147_vm1, %v141_v7  ;;  %216 = vmatpush.msra.mxu2 %v1336_v6  ;;  %v1419_v37 = vld [vmem:[%s1718_s4] sm:$0xff] }
   0xa   :  { %257 = vmatpush.msrb.mxu1 %v1387_v31  ;;  %240 = vmatpush.msra.mxu3 %v1409_v35  ;;  %v1459_v44 = vld [vmem:[%s1719_s6] ss:$0 sm:$0xff] }
   0xb   :  { %330 = vmatpush.msrb.mxu2 %v1308_v0  ;;  %1135 = vmatmul.msk.f32.vlgmr.msra.gmra.mxu3 %vm147_vm1, %v1131_v36 }
   0xc   :  { %258 = vmatpush.msrb.mxu1 %v1398_v33  ;;  %356 = vmatpush.msrb.mxu3 %v1376_v29 }
   0xd   :  { %331 = vmatpush.msrb.mxu2 %v1316_v2  ;;  %1124 = vmatmul.msk.f32.gmra.mxu0 %vm75_vm0, %v65_v40 }
   0xe   :  { %259 = vmatpush.msrb.mxu1 %v1404_v34  ;;  %357 = vmatpush.msrb.mxu3 %v1381_v30 }
   0xf   :  { %332 = vmatpush.msrb.mxu2 %v1328_v5 }
  0x10   :  { %260 = vmatpush.msrb.mxu1 %v1419_v37  ;;  %358 = vmatpush.msrb.mxu3 %v1392_v32 }
  0x11   :  { %333 = vmatpush.msrb.mxu2 %v1336_v6 }
  0x12   :  { %376 = vmatpush.msra.mxu1 %v1387_v31  ;;  %359 = vmatpush.msrb.mxu3 %v1409_v35 }
  0x14   :  { %377 = vmatpush.msra.mxu1 %v1398_v33  ;;  %468 = vmatpush.msra.mxu3 %v1376_v29 }
  0x16   :  { %378 = vmatpush.msra.mxu1 %v1404_v34  ;;  %469 = vmatpush.msra.mxu3 %v1381_v30 }
  0x18   :  { %379 = vmatpush.msra.mxu1 %v1419_v37  ;;  %470 = vmatpush.msra.mxu3 %v1392_v32 }
  0x1a   :  { %471 = vmatpush.msra.mxu3 %v1409_v35 }
  0x82   :  { %v117_v10 = vpop.f32.mrf.mxu0 }
  0x83   :  { %v118_v11 = vadd.f32 %v1354_v8, %v117_v10 }
  0x86   :  { %v168_v13 = vpop.f32.mrf.mxu1 }
  0x87   :  { %v171_v14 = vadd.f32 %v168_v13, %v118_v11 }
  0x89   :  { %1167 = vtanh.f32 %v171_v14 }
  0x8a   :  { %v120_v46 = vpop.f32.mrf.mxu0 }
  0x8b   :  { %v121_v49 = vadd.f32 %v1354_v8, %v120_v46 }
  0x8e   :  { %v242_v43 = vpop.f32.mrf.mxu3 }
  0x8f   :  { %v1168_v17 = vpop.eup %1167 }
  0x90   :  { %v173_v19 = vmul.f32 %v1168_v17, %v1357_v16  ;;  %v66_v17 = vld [vmem:[%s1713_s0 + $0x10] sm:$0xff] }
  0x91   :  { %1125 = vmatmul.msk.f32.gmra.mxu0 %vm75_vm0, %v66_v17 }
  0x92   :  { %v174_v20 = vadd.f32 %v173_v19, %v1359_v18 }
  0x94   :  { %181 = vrot.lane.b32.xlu0 %v174_v20, %s1232_s3 }
  0x9c   :  { %176 = vrot.lane.b32.xlu0 %v144_v21, %s1233_s26 }
 0x106   :  { %v182_v22 = vpop.permute.xlu0 %181 }
 0x107   :  { %v184_v23 = vmul.f32 %v182_v22, %v174_v20 }
 0x109   :  { %186 = vrot.lane.b32.xlu1 %v184_v23, %s1233_s26 }
 0x10e   :  { %v177_v24 = vpop.permute.xlu0 %176  ;;  %v123_v21 = vpop.f32.mrf.mxu0 }
 0x10f   :  { %v179_v25 = vmul.f32 %v177_v24, %v174_v20 }
 0x17b   :  { %v187_v26 = vpop.permute.xlu1 %186 }
 0x17c   :  { %v1369_v27 = vadd.f32 %v187_v26, %v179_v25  ;;  %v124_v26 = vadd.f32 %v1354_v8, %v123_v21 }
 0x17e   :  { %1169 = vtanh.f32 %v1369_v27 }
 0x184   :  { %v1170_v28 = vpop.eup %1169 }
 0x185   :  { %192 = vrot.lane.b32.xlu1 %v1170_v28, %s1232_s3 }
 0x18d   :  { %293 = vrot.lane.b32.xlu1 %v1132_v41, %s1233_s26 }
 0x1f7   :  { %v193_v38 = vpop.permute.xlu1 %192 }
 0x1f8   :  { %v195_v39 = vmul.f32 %v193_v38, %v174_v20 }
 0x1fa   :  { %197 = vrot.lane.b32.xlu2 %v195_v39, %s1233_s26 }
 0x1ff   :  { %v294_v62 = vpop.permute.xlu1 %293 }
 0x254   :  { %v198_v42 = vpop.permute.xlu2 %197 }
 0x255   :  { %1134 = vmatmul.msk.f32.vlgmr.msra.gmra.mxu2 %vm147_vm1, %v198_v42  ;;  %1136 = vmatmul.msk.f32.vlgmr.msrb.gmra.mxu1 %vm147_vm1, %v198_v42 }
 0x256   :  { %488 = vmatpush.msrb.mxu1 %v1387_v31  ;;  %442 = vmatpush.msra.mxu2 %v1308_v0 }
 0x258   :  { %489 = vmatpush.msrb.mxu1 %v1398_v33  ;;  %443 = vmatpush.msra.mxu2 %v1316_v2 }
 0x25a   :  { %490 = vmatpush.msrb.mxu1 %v1404_v34  ;;  %444 = vmatpush.msra.mxu2 %v1328_v5 }
 0x25c   :  { %491 = vmatpush.msrb.mxu1 %v1419_v37  ;;  %445 = vmatpush.msra.mxu2 %v1336_v6 }
 0x2d2   :  { %v262_v45 = vpop.f32.mrf.mxu1 }
 0x2d3   :  { %v263_v47 = vadd.f32 %v262_v45, %v242_v43 }
 0x2d5   :  { %v268_v48 = vadd.f32 %v1459_v44, %v263_v47 }
 0x2d7   :  { %1171 = vtanh.f32 %v268_v48 }
 0x2d8   :  { %v218_v50 = vpop.f32.mrf.mxu2 }
 0x2d9   :  { %v221_v51 = vadd.f32 %v218_v50, %v121_v49 }
 0x2db   :  { %1173 = vtanh.f32 %v221_v51 }
 0x2dd   :  { %v1172_v52 = vpop.eup %1171 }
 0x2de   :  { %v290_v53 = vmul.f32 %v1172_v52, %v1357_v16 }
 0x2e0   :  { %v291_v54 = vadd.f32 %v290_v53, %v1359_v18 }
 0x2e1   :  { %v1174_v55 = vpop.eup %1173 }
 0x2e2   :  { %v270_v56 = vmul.f32 %v1174_v55, %v1357_v16  ;;  %298 = vrot.lane.b32.xlu2 %v291_v54, %s1232_s3  ;;  %v296_v63 = vmul.f32 %v294_v62, %v291_v54 }
 0x2e4   :  { %v271_v57 = vadd.f32 %v270_v56, %v1359_v18 }
 0x2e6   :  { %274 = vrot.lane.b32.xlu0 %v271_v57, %s1232_s3  ;;  %v272_v7 = vmul.f32 %v271_v57, %v1369_v27 }
 0x33c   :  { %v299_v58 = vpop.permute.xlu2 %298 }
 0x33d   :  { %v301_v59 = vmul.f32 %v299_v58, %v291_v54 }
 0x33f   :  { %303 = vrot.lane.b32.xlu2 %v301_v59, %s1233_s26 }
 0x358   :  { %v275_v60 = vpop.permute.xlu0 %274 }
 0x359   :  { %v277_v61 = vmul.f32 %v275_v60, %v271_v57  ;;  %v67_v60 = vld [vmem:[%s1713_s0 + $0x18] sm:$0xff] }
 0x35a   :  { %1126 = vmatmul.msk.f32.gmra.mxu0 %vm75_vm0, %v67_v60 }
 0x35b   :  { %279 = vrot.lane.b32.xlu0 %v277_v61, %s1233_s26 }
 0x399   :  { %v304_v1 = vpop.permute.xlu2 %303 }
 0x39a   :  { %v306_v3 = vadd.f32 %v304_v1, %v296_v63 }
 0x39c   :  { %1175 = vtanh.f32 %v306_v3 }
 0x3a2   :  { %v1176_v4 = vpop.eup %1175 }
 0x3a3   :  { %309 = vrot.lane.b32.xlu1 %v1176_v4, %s1232_s3 }
 0x3cd   :  { %v280_v9 = vpop.permute.xlu0 %279 }
 0x3ce   :  { %v282_v10 = vadd.f32 %v280_v9, %v272_v7 }
 0x3d0   :  { %1177 = vtanh.f32 %v282_v10 }
 0x3d6   :  { %v1178_v11 = vpop.eup %1177 }
 0x3d7   :  { %285 = vrot.lane.b32.xlu2 %v1178_v11, %s1232_s3  ;;  %v126_v63 = vpop.f32.mrf.mxu0 }
 0x3d8   :  { %v127_v9 = vadd.f32 %v1354_v8, %v126_v63 }
 0x415   :  { %v310_v12 = vpop.permute.xlu1 %309 }
 0x416   :  { %v312_v13 = vmul.f32 %v310_v12, %v291_v54 }
 0x418   :  { %340 = vrot.lane.b32.xlu0 %v312_v13, %s1233_s26 }
 0x431   :  { %v286_v14 = vpop.permute.xlu2 %285 }
 0x432   :  { %v288_v15 = vmul.f32 %v286_v14, %v271_v57 }
 0x434   :  { %314 = vrot.lane.b32.xlu1 %v288_v15, %s1233_s26 }
 0x48a   :  { %v341_v19 = vpop.permute.xlu0 %340 }
 0x48b   :  { %1138 = vmatmul.msk.f32.vlgmr.msrb.gmra.mxu3 %vm147_vm1, %v341_v19 }
 0x48c   :  { %580 = vmatpush.msrb.mxu3 %v1376_v29 }
 0x48e   :  { %581 = vmatpush.msrb.mxu3 %v1381_v30 }
 0x490   :  { %582 = vmatpush.msrb.mxu3 %v1392_v32 }
 0x492   :  { %583 = vmatpush.msrb.mxu3 %v1409_v35 }
 0x4a6   :  { %v315_v20 = vpop.permute.xlu1 %314 }
 0x4a7   :  { %1137 = vmatmul.msk.f32.vlgmr.msrb.gmra.mxu2 %vm147_vm1, %v315_v20  ;;  %1139 = vmatmul.msk.f32.vlgmr.msra.gmra.mxu1 %vm147_vm1, %v315_v20 }
 0x4a8   :  { %554 = vmatpush.msrb.mxu2 %v1308_v0  ;;  %600 = vmatpush.msra.mxu1 %v1387_v31 }
 0x4aa   :  { %555 = vmatpush.msrb.mxu2 %v1316_v2  ;;  %601 = vmatpush.msra.mxu1 %v1398_v33 }
 0x4ac   :  { %556 = vmatpush.msrb.mxu2 %v1328_v5  ;;  %602 = vmatpush.msra.mxu1 %v1404_v34 }
 0x4ae   :  { %557 = vmatpush.msrb.mxu2 %v1336_v6  ;;  %603 = vmatpush.msra.mxu1 %v1419_v37 }
 0x50e   :  { %v361_v22 = vpop.f32.mrf.mxu3 }
 0x524   :  { %v381_v23 = vpop.f32.mrf.mxu1 }
 0x525   :  { %v382_v24 = vadd.f32 %v381_v23, %v361_v22 }
 0x527   :  { %v384_v25 = vadd.f32 %v1459_v44, %v382_v24 }
 0x529   :  { %1179 = vtanh.f32 %v384_v25 }
 0x52a   :  { %v335_v27 = vpop.f32.mrf.mxu2 }
 0x52b   :  { %v338_v28 = vadd.f32 %v335_v27, %v124_v26 }
 0x52d   :  { %1181 = vtanh.f32 %v338_v28 }
 0x52f   :  { %v1180_v36 = vpop.eup %1179 }
 0x530   :  { %v406_v38 = vmul.f32 %v1180_v36, %v1357_v16 }
 0x532   :  { %v407_v39 = vadd.f32 %v406_v38, %v1359_v18 }
 0x533   :  { %v1182_v40 = vpop.eup %1181 }
 0x534   :  { %v386_v41 = vmul.f32 %v1182_v40, %v1357_v16  ;;  %410 = vrot.lane.b32.xlu2 %v407_v39, %s1232_s3  ;;  %v408_v48 = vmul.f32 %v407_v39, %v306_v3 }
 0x536   :  { %v387_v42 = vadd.f32 %v386_v41, %v1359_v18 }
 0x538   :  { %390 = vrot.lane.b32.xlu0 %v387_v42, %s1232_s3  ;;  %v388_v51 = vmul.f32 %v387_v42, %v282_v10 }
 0x58e   :  { %v411_v43 = vpop.permute.xlu2 %410 }
 0x58f   :  { %v413_v45 = vmul.f32 %v411_v43, %v407_v39 }
 0x591   :  { %415 = vrot.lane.b32.xlu1 %v413_v45, %s1233_s26  ;;  %v68_v45 = vld [vmem:[%s1713_s0 + $0x20] sm:$0xff] }
 0x592   :  { %1127 = vmatmul.msk.f32.gmra.mxu0 %vm75_vm0, %v68_v45 }
 0x5aa   :  { %v391_v46 = vpop.permute.xlu0 %390 }
 0x5ab   :  { %v393_v47 = vmul.f32 %v391_v46, %v387_v42 }
 0x5ad   :  { %395 = vrot.lane.b32.xlu2 %v393_v47, %s1233_s26 }
 0x603   :  { %v416_v49 = vpop.permute.xlu1 %415 }
 0x604   :  { %v1505_v50 = vadd.f32 %v416_v49, %v408_v48 }
 0x606   :  { %1183 = vtanh.f32 %v1505_v50 }
 0x607   :  { %v396_v52 = vpop.permute.xlu2 %395 }
 0x608   :  { %v398_v53 = vadd.f32 %v396_v52, %v388_v51 }
 0x60a   :  { %1185 = vtanh.f32 %v398_v53 }
 0x60c   :  { %v1184_v54 = vpop.eup %1183 }
 0x60d   :  { %421 = vrot.lane.b32.xlu0 %v1184_v54, %s1232_s3 }
 0x60f   :  { %v129_v48 = vpop.f32.mrf.mxu0 }
 0x610   :  { %v1186_v55 = vpop.eup %1185  ;;  %v130_v49 = vadd.f32 %v1354_v8, %v129_v48 }
 0x611   :  { %401 = vrot.lane.b32.xlu1 %v1186_v55, %s1232_s3 }
 0x67f   :  { %v422_v56 = vpop.permute.xlu0 %421 }
 0x680   :  { %v424_v57 = vmul.f32 %v422_v56, %v407_v39 }
 0x682   :  { %452 = vrot.lane.b32.xlu2 %v424_v57, %s1233_s26 }
 0x683   :  { %v402_v58 = vpop.permute.xlu1 %401 }
 0x684   :  { %v404_v59 = vmul.f32 %v402_v58, %v387_v42 }
 0x686   :  { %426 = vrot.lane.b32.xlu0 %v404_v59, %s1233_s26 }
 0x6dc   :  { %v453_v61 = vpop.permute.xlu2 %452 }
 0x6dd   :  { %1141 = vmatmul.msk.f32.vlgmr.msra.gmra.mxu3 %vm147_vm1, %v453_v61 }
 0x6de   :  { %692 = vmatpush.msra.mxu3 %v1376_v29 }
 0x6e0   :  { %693 = vmatpush.msra.mxu3 %v1381_v30 }
 0x6e2   :  { %694 = vmatpush.msra.mxu3 %v1392_v32 }
 0x6e4   :  { %695 = vmatpush.msra.mxu3 %v1409_v35 }
 0x6f8   :  { %v427_v62 = vpop.permute.xlu0 %426 }
 0x6f9   :  { %1140 = vmatmul.msk.f32.vlgmr.msra.gmra.mxu2 %vm147_vm1, %v427_v62  ;;  %1142 = vmatmul.msk.f32.vlgmr.msrb.gmra.mxu1 %vm147_vm1, %v427_v62 }
 0x6fa   :  { %666 = vmatpush.msra.mxu2 %v1308_v0  ;;  %712 = vmatpush.msrb.mxu1 %v1387_v31 }
 0x6fc   :  { %667 = vmatpush.msra.mxu2 %v1316_v2  ;;  %713 = vmatpush.msrb.mxu1 %v1398_v33 }
 0x6fe   :  { %668 = vmatpush.msra.mxu2 %v1328_v5  ;;  %714 = vmatpush.msrb.mxu1 %v1404_v34 }
 0x700   :  { %669 = vmatpush.msra.mxu2 %v1336_v6  ;;  %715 = vmatpush.msrb.mxu1 %v1419_v37 }
 0x760   :  { %v473_v1 = vpop.f32.mrf.mxu3 }
 0x776   :  { %v493_v3 = vpop.f32.mrf.mxu1 }
 0x777   :  { %v494_v4 = vadd.f32 %v493_v3, %v473_v1 }
 0x779   :  { %v496_v7 = vadd.f32 %v1459_v44, %v494_v4 }
 0x77b   :  { %1187 = vtanh.f32 %v496_v7 }
 0x77c   :  { %v447_v10 = vpop.f32.mrf.mxu2 }
 0x77d   :  { %v450_v11 = vadd.f32 %v447_v10, %v127_v9 }
 0x77f   :  { %1189 = vtanh.f32 %v450_v11 }
 0x781   :  { %v1188_v12 = vpop.eup %1187 }
 0x782   :  { %v518_v13 = vmul.f32 %v1188_v12, %v1357_v16 }
 0x784   :  { %v519_v14 = vadd.f32 %v518_v13, %v1359_v18 }
 0x785   :  { %v1190_v15 = vpop.eup %1189 }
 0x786   :  { %v498_v17 = vmul.f32 %v1190_v15, %v1357_v16  ;;  %522 = vrot.lane.b32.xlu1 %v519_v14, %s1232_s3  ;;  %v520_v28 = vmul.f32 %v519_v14, %v1505_v50 }
 0x788   :  { %v499_v19 = vadd.f32 %v498_v17, %v1359_v18 }
 0x78a   :  { %502 = vrot.lane.b32.xlu2 %v499_v19, %s1232_s3  ;;  %v500_v24 = vmul.f32 %v499_v19, %v398_v53 }
 0x7e4   :  { %v503_v20 = vpop.permute.xlu2 %502 }
 0x7e5   :  { %v505_v21 = vmul.f32 %v503_v20, %v499_v19 }
 0x7e7   :  { %507 = vrot.lane.b32.xlu1 %v505_v21, %s1233_s26  ;;  %v69_v21 = vld [vmem:[%s1713_s0 + $0x28] sm:$0xff] }
 0x7e8   :  { %1128 = vmatmul.msk.f32.gmra.mxu0 %vm75_vm0, %v69_v21 }
 0x7f8   :  { %v523_v22 = vpop.permute.xlu1 %522 }
 0x7f9   :  { %v525_v23 = vmul.f32 %v523_v22, %v519_v14 }
 0x7fb   :  { %527 = vrot.lane.b32.xlu0 %v525_v23, %s1233_s26 }
 0x859   :  { %v508_v25 = vpop.permute.xlu1 %507 }
 0x85a   :  { %v510_v26 = vadd.f32 %v508_v25, %v500_v24 }
 0x85c   :  { %1191 = vtanh.f32 %v510_v26 }
 0x862   :  { %v1192_v27 = vpop.eup %1191 }
 0x863   :  { %513 = vrot.lane.b32.xlu0 %v1192_v27, %s1232_s3 }
 0x86d   :  { %v528_v36 = vpop.permute.xlu0 %527 }
 0x86e   :  { %v530_v38 = vadd.f32 %v528_v36, %v520_v28 }
 0x870   :  { %1193 = vtanh.f32 %v530_v38 }
 0x876   :  { %v1194_v39 = vpop.eup %1193 }
 0x877   :  { %533 = vrot.lane.b32.xlu2 %v1194_v39, %s1232_s3 }
 0x8d1   :  { %v534_v40 = vpop.permute.xlu2 %533 }
 0x8d2   :  { %v536_v41 = vmul.f32 %v534_v40, %v519_v14 }
 0x8d4   :  { %564 = vrot.lane.b32.xlu1 %v536_v41, %s1233_s26 }
 0x8d5   :  { %v514_v42 = vpop.permute.xlu0 %513 }
 0x8d6   :  { %v516_v43 = vmul.f32 %v514_v42, %v499_v19 }
 0x8d8   :  { %538 = vrot.lane.b32.xlu2 %v516_v43, %s1233_s26 }
 0x932   :  { %v539_v46 = vpop.permute.xlu2 %538 }
 0x933   :  { %1143 = vmatmul.msk.f32.vlgmr.msrb.gmra.mxu2 %vm147_vm1, %v539_v46  ;;  %1145 = vmatmul.msk.f32.vlgmr.msra.gmra.mxu1 %vm147_vm1, %v539_v46 }
 0x934   :  { %778 = vmatpush.msrb.mxu2 %v1308_v0  ;;  %824 = vmatpush.msra.mxu1 %v1387_v31 }
 0x936   :  { %779 = vmatpush.msrb.mxu2 %v1316_v2  ;;  %825 = vmatpush.msra.mxu1 %v1398_v33 }
 0x938   :  { %780 = vmatpush.msrb.mxu2 %v1328_v5  ;;  %826 = vmatpush.msra.mxu1 %v1404_v34 }
 0x93a   :  { %781 = vmatpush.msrb.mxu2 %v1336_v6  ;;  %827 = vmatpush.msra.mxu1 %v1419_v37 }
 0x946   :  { %v565_v47 = vpop.permute.xlu1 %564 }
 0x947   :  { %1144 = vmatmul.msk.f32.vlgmr.msrb.gmra.mxu3 %vm147_vm1, %v565_v47 }
 0x948   :  { %804 = vmatpush.msrb.mxu3 %v1376_v29 }
 0x94a   :  { %805 = vmatpush.msrb.mxu3 %v1381_v30 }
 0x94c   :  { %806 = vmatpush.msrb.mxu3 %v1392_v32 }
 0x94e   :  { %807 = vmatpush.msrb.mxu3 %v1409_v35 }
 0x9b0   :  { %v605_v55 = vpop.f32.mrf.mxu1 }
 0x9b6   :  { %v559_v50 = vpop.f32.mrf.mxu2 }
 0x9b7   :  { %v562_v51 = vadd.f32 %v559_v50, %v130_v49 }
 0x9b9   :  { %1195 = vtanh.f32 %v562_v51 }
 0x9bf   :  { %v1196_v52 = vpop.eup %1195 }
 0x9c0   :  { %v610_v53 = vmul.f32 %v1196_v52, %v1357_v16 }
 0x9c2   :  { %v611_v54 = vadd.f32 %v610_v53, %v1359_v18 }
 0x9c4   :  { %614 = vrot.lane.b32.xlu1 %v611_v54, %s1232_s3  ;;  %v612_v10 = vmul.f32 %v611_v54, %v510_v26 }
 0x9ca   :  { %v585_v56 = vpop.f32.mrf.mxu3 }
 0x9cb   :  { %v606_v57 = vadd.f32 %v605_v55, %v585_v56 }
 0x9cd   :  { %v608_v58 = vadd.f32 %v1459_v44, %v606_v57 }
 0x9cf   :  { %1197 = vtanh.f32 %v608_v58 }
 0x9d5   :  { %v1198_v59 = vpop.eup %1197 }
 0x9d6   :  { %v630_v60 = vmul.f32 %v1198_v59, %v1357_v16  ;;  %v70_v59 = vld [vmem:[%s1713_s0 + $0x30] sm:$0xff] }
 0x9d7   :  { %1129 = vmatmul.msk.f32.gmra.mxu0 %vm75_vm0, %v70_v59 }
 0x9d8   :  { %v631_v61 = vadd.f32 %v630_v60, %v1359_v18 }
 0x9da   :  { %634 = vrot.lane.b32.xlu0 %v631_v61, %s1232_s3  ;;  %v632_v4 = vmul.f32 %v631_v61, %v530_v38 }
 0xa36   :  { %v615_v62 = vpop.permute.xlu1 %614 }
 0xa37   :  { %v617_v63 = vmul.f32 %v615_v62, %v611_v54 }
 0xa39   :  { %619 = vrot.lane.b32.xlu0 %v617_v63, %s1233_s26 }
 0xa4c   :  { %v635_v1 = vpop.permute.xlu0 %634 }
 0xa4d   :  { %v637_v3 = vmul.f32 %v635_v1, %v631_v61 }
 0xa4f   :  { %639 = vrot.lane.b32.xlu2 %v637_v3, %s1233_s26 }
 0xaa9   :  { %v640_v7 = vpop.permute.xlu2 %639 }
 0xaaa   :  { %v1575_v9 = vadd.f32 %v640_v7, %v632_v4 }
 0xaab   :  { %v620_v11 = vpop.permute.xlu0 %619 }
 0xaac   :  { %1199 = vtanh.f32 %v1575_v9  ;;  %v622_v12 = vadd.f32 %v620_v11, %v612_v10 }
 0xaae   :  { %1201 = vtanh.f32 %v622_v12 }
 0xab2   :  { %v1200_v13 = vpop.eup %1199 }
 0xab3   :  { %645 = vrot.lane.b32.xlu1 %v1200_v13, %s1232_s3 }
 0xab4   :  { %v1202_v14 = vpop.eup %1201 }
 0xab5   :  { %625 = vrot.lane.b32.xlu2 %v1202_v14, %s1232_s3 }
 0xb0f   :  { %v626_v15 = vpop.permute.xlu2 %625 }
 0xb10   :  { %v628_v17 = vmul.f32 %v626_v15, %v611_v54 }
 0xb12   :  { %650 = vrot.lane.b32.xlu1 %v628_v17, %s1233_s26 }
 0xb25   :  { %v646_v19 = vpop.permute.xlu1 %645 }
 0xb26   :  { %v648_v20 = vmul.f32 %v646_v19, %v631_v61 }
 0xb28   :  { %676 = vrot.lane.b32.xlu0 %v648_v20, %s1233_s26 }
 0xb84   :  { %v651_v22 = vpop.permute.xlu1 %650 }
 0xb85   :  { %1146 = vmatmul.msk.f32.vlgmr.msra.gmra.mxu2 %vm147_vm1, %v651_v22  ;;  %1148 = vmatmul.msk.f32.vlgmr.msrb.gmra.mxu1 %vm147_vm1, %v651_v22 }
 0xb86   :  { %890 = vmatpush.msra.mxu2 %v1308_v0  ;;  %936 = vmatpush.msrb.mxu1 %v1387_v31  ;;  %v132_v0 = vpop.f32.mrf.mxu0 }
 0xb88   :  { %891 = vmatpush.msra.mxu2 %v1316_v2  ;;  %937 = vmatpush.msrb.mxu1 %v1398_v33  ;;  %v133_v2 = vadd.f32 %v1354_v8, %v132_v0 }
 0xb8a   :  { %892 = vmatpush.msra.mxu2 %v1328_v5  ;;  %938 = vmatpush.msrb.mxu1 %v1404_v34 }
 0xb8c   :  { %893 = vmatpush.msra.mxu2 %v1336_v6  ;;  %939 = vmatpush.msrb.mxu1 %v1419_v37 }
 0xb8e   :  { %v135_v62 = vpop.f32.mrf.mxu0 }
 0xb8f   :  { %v136_v63 = vadd.f32 %v1354_v8, %v135_v62 }
 0xb9a   :  { %v677_v23 = vpop.permute.xlu0 %676 }
 0xb9b   :  { %1147 = vmatmul.msk.f32.vlgmr.msra.gmra.mxu3 %vm147_vm1, %v677_v23 }
 0xb9c   :  { %916 = vmatpush.msra.mxu3 %v1376_v29 }
 0xb9e   :  { %917 = vmatpush.msra.mxu3 %v1381_v30 }
 0xba0   :  { %918 = vmatpush.msra.mxu3 %v1392_v32 }
 0xba2   :  { %919 = vmatpush.msra.mxu3 %v1409_v35 }
 0xc02   :  { %v717_v27 = vpop.f32.mrf.mxu1 }
 0xc08   :  { %v671_v5 = vpop.f32.mrf.mxu2 }
 0xc09   :  { %v674_v24 = vadd.f32 %v671_v5, %v133_v2 }
 0xc0b   :  { %1203 = vtanh.f32 %v674_v24  ;;  %v71_v24 = vld [vmem:[%s1713_s0 + $0x38] sm:$0xff] }
 0xc0c   :  { %1130 = vmatmul.msk.f32.gmra.mxu0 %vm75_vm0, %v71_v24 }
 0xc11   :  { %v1204_v6 = vpop.eup %1203 }
 0xc12   :  { %v722_v25 = vmul.f32 %v1204_v6, %v1357_v16 }
 0xc14   :  { %v723_v26 = vadd.f32 %v722_v25, %v1359_v18 }
 0xc16   :  { %726 = vrot.lane.b32.xlu0 %v723_v26, %s1232_s3  ;;  %v724_v47 = vmul.f32 %v723_v26, %v622_v12 }
 0xc1e   :  { %v697_v28 = vpop.f32.mrf.mxu3 }
 0xc1f   :  { %v718_v36 = vadd.f32 %v717_v27, %v697_v28 }
 0xc21   :  { %v720_v38 = vadd.f32 %v1459_v44, %v718_v36 }
 0xc23   :  { %1205 = vtanh.f32 %v720_v38 }
 0xc29   :  { %v1206_v39 = vpop.eup %1205 }
 0xc2a   :  { %v742_v40 = vmul.f32 %v1206_v39, %v1357_v16 }
 0xc2c   :  { %v743_v41 = vadd.f32 %v742_v40, %v1359_v18 }
 0xc2e   :  { %746 = vrot.lane.b32.xlu2 %v743_v41, %s1232_s3  ;;  %v744_v51 = vmul.f32 %v743_v41, %v1575_v9 }
 0xc88   :  { %v747_v42 = vpop.permute.xlu2 %746  ;;  %v727_v43 = vpop.permute.xlu0 %726 }
 0xc89   :  { %v749_v45 = vmul.f32 %v747_v42, %v743_v41  ;;  %v729_v46 = vmul.f32 %v727_v43, %v723_v26 }
 0xc8b   :  { %751 = vrot.lane.b32.xlu1 %v749_v45, %s1233_s26  ;;  %731 = vrot.lane.b32.xlu2 %v729_v46, %s1233_s26 }
 0xce5   :  { %v732_v48 = vpop.permute.xlu2 %731 }
 0xce6   :  { %v734_v49 = vadd.f32 %v732_v48, %v724_v47 }
 0xce8   :  { %1207 = vtanh.f32 %v734_v49 }
 0xcee   :  { %v1208_v50 = vpop.eup %1207 }
 0xcef   :  { %737 = vrot.lane.b32.xlu1 %v1208_v50, %s1232_s3 }
 0xcfd   :  { %v752_v52 = vpop.permute.xlu1 %751 }
 0xcfe   :  { %v754_v53 = vadd.f32 %v752_v52, %v744_v51 }
 0xd00   :  { %1209 = vtanh.f32 %v754_v53 }
 0xd06   :  { %v1210_v54 = vpop.eup %1209 }
 0xd07   :  { %757 = vrot.lane.b32.xlu0 %v1210_v54, %s1232_s3 }
 0xd61   :  { %v738_v55 = vpop.permute.xlu1 %737 }
 0xd62   :  { %v740_v56 = vmul.f32 %v738_v55, %v723_v26  ;;  %v138_v26 = vpop.f32.mrf.mxu0 }
 0xd63   :  { %v139_v27 = vadd.f32 %v1354_v8, %v138_v26 }
 0xd64   :  { %762 = vrot.lane.b32.xlu0 %v740_v56, %s1233_s26 }
 0xd79   :  { %v758_v57 = vpop.permute.xlu0 %757 }
 0xd7a   :  { %v760_v58 = vmul.f32 %v758_v57, %v743_v41 }
 0xd7c   :  { %788 = vrot.lane.b32.xlu2 %v760_v58, %s1233_s26 }
 0xdd6   :  { %v789_v60 = vpop.permute.xlu2 %788  ;;  %v763_v61 = vpop.permute.xlu0 %762 }
 0xdd7   :  { %1149 = vmatmul.msk.f32.vlgmr.msrb.gmra.mxu2 %vm147_vm1, %v763_v61  ;;  %1150 = vmatmul.msk.f32.vlgmr.msrb.gmra.mxu3 %vm147_vm1, %v789_v60 }
 0xdd8   :  { %1151 = vmatmul.msk.f32.vlgmr.msra.gmra.mxu1 %vm147_vm1, %v763_v61  ;;  %1027 = vmatpush.msrb.mxu3 %v1387_v31 }
 0xdd9   :  { %1002 = vmatpush.msrb.mxu2 %v1376_v29 }
 0xdda   :  { %1028 = vmatpush.msrb.mxu3 %v1398_v33 }
 0xddb   :  { %1003 = vmatpush.msrb.mxu2 %v1381_v30 }
 0xddc   :  { %1029 = vmatpush.msrb.mxu3 %v1404_v34 }
 0xddd   :  { %1004 = vmatpush.msrb.mxu2 %v1392_v32 }
 0xdde   :  { %1030 = vmatpush.msrb.mxu3 %v1419_v37 }
 0xddf   :  { %1005 = vmatpush.msrb.mxu2 %v1409_v35 }
 0xe55   :  { %v829_v1 = vpop.f32.mrf.mxu1 }
 0xe5a   :  { %v783_v3 = vpop.f32.mrf.mxu2  ;;  %v809_v31 = vpop.f32.mrf.mxu3 }
 0xe5b   :  { %v786_v4 = vadd.f32 %v783_v3, %v136_v63  ;;  %v830_v29 = vadd.f32 %v829_v1, %v809_v31 }
 0xe5d   :  { %1211 = vtanh.f32 %v786_v4  ;;  %v832_v33 = vadd.f32 %v1459_v44, %v830_v29 }
 0xe5f   :  { %1213 = vtanh.f32 %v832_v33 }
 0xe63   :  { %v1212_v30 = vpop.eup %1211 }
 0xe64   :  { %v834_v34 = vmul.f32 %v1212_v30, %v1357_v16 }
 0xe65   :  { %v1214_v32 = vpop.eup %1213 }
 0xe66   :  { %v835_v37 = vadd.f32 %v834_v34, %v1359_v18  ;;  %v854_v35 = vmul.f32 %v1214_v32, %v1357_v16 }
 0xe68   :  { %838 = vrot.lane.b32.xlu2 %v835_v37, %s1232_s3  ;;  %v855_v7 = vadd.f32 %v854_v35, %v1359_v18  ;;  %v836_v13 = vmul.f32 %v835_v37, %v734_v49 }
 0xe6a   :  { %858 = vrot.lane.b32.xlu1 %v855_v7, %s1232_s3  ;;  %v856_v19 = vmul.f32 %v855_v7, %v754_v53 }
 0xec2   :  { %v839_v9 = vpop.permute.xlu2 %838 }
 0xec3   :  { %v841_v10 = vmul.f32 %v839_v9, %v835_v37 }
 0xec5   :  { %843 = vrot.lane.b32.xlu1 %v841_v10, %s1233_s26 }
 0xedc   :  { %v859_v11 = vpop.permute.xlu1 %858 }
 0xedd   :  { %v861_v12 = vmul.f32 %v859_v11, %v855_v7 }
 0xedf   :  { %863 = vrot.lane.b32.xlu0 %v861_v12, %s1233_s26  ;;  %v1077_v12 = vld [vmem:[%s1722_s9 + $0x8] sm:$0xff] }
 0xf37   :  { %v844_v14 = vpop.permute.xlu1 %843 }
 0xf38   :  { %v846_v15 = vadd.f32 %v844_v14, %v836_v13  ;;  %v1076_v13 = vld [vmem:[%s1722_s9] sm:$0xff] }
 0xf3a   :  { %1215 = vtanh.f32 %v846_v15 }
 0xf40   :  { %v1216_v17 = vpop.eup %1215 }
 0xf41   :  { %849 = vrot.lane.b32.xlu0 %v1216_v17, %s1232_s3 }
 0xf51   :  { %v864_v20 = vpop.permute.xlu0 %863 }
 0xf52   :  { %v866_v21 = vadd.f32 %v864_v20, %v856_v19 }
 0xf54   :  { %1217 = vtanh.f32 %v866_v21 }
 0xf5a   :  { %v1218_v22 = vpop.eup %1217 }
 0xf5b   :  { %869 = vrot.lane.b32.xlu2 %v1218_v22, %s1232_s3  ;;  %v1166_v22 = vld [vmem:[%s1723_s10] ss:$0 sm:$0xff] }
 0xfb3   :  { %v850_v23 = vpop.permute.xlu0 %849 }
 0xfb4   :  { %v852_v0 = vmul.f32 %v850_v23, %v835_v37 }
 0xfb5   :  { %v870_v2 = vpop.permute.xlu2 %869 }
 0xfb6   :  { %v872_v5 = vmul.f32 %v870_v2, %v855_v7  ;;  %874 = vrot.lane.b32.xlu2 %v852_v0, %s1233_s26 }
 0xfb8   :  { %900 = vrot.lane.b32.xlu1 %v872_v5, %s1233_s26 }
0x1010   :  { %v875_v6 = vpop.permute.xlu2 %874 }
0x1011   :  { %1152 = vmatmul.msk.f32.vlgmr.msra.gmra.mxu2 %vm147_vm1, %v875_v6  ;;  %1154 = vmatmul.msk.f32.vlgmr.msrb.gmra.mxu1 %vm147_vm1, %v875_v6 }
0x102a   :  { %v901_v25 = vpop.permute.xlu1 %900 }
0x102b   :  { %1153 = vmatmul.msk.f32.vlgmr.msra.gmra.mxu3 %vm147_vm1, %v901_v25 }
0x108e   :  { %v941_v41 = vpop.f32.mrf.mxu1 }
0x1094   :  { %v895_v28 = vpop.f32.mrf.mxu2 }
0x1095   :  { %v898_v36 = vadd.f32 %v895_v28, %v139_v27 }
0x1097   :  { %1219 = vtanh.f32 %v898_v36 }
0x109d   :  { %v1220_v38 = vpop.eup %1219 }
0x109e   :  { %v946_v39 = vmul.f32 %v1220_v38, %v1357_v16 }
0x10a0   :  { %v947_v40 = vadd.f32 %v946_v39, %v1359_v18 }
0x10a2   :  { %950 = vrot.lane.b32.xlu0 %v947_v40, %s1232_s3  ;;  %v948_v52 = vmul.f32 %v947_v40, %v846_v15 }
0x10ae   :  { %v921_v42 = vpop.f32.mrf.mxu3 }
0x10af   :  { %v942_v43 = vadd.f32 %v941_v41, %v921_v42 }
0x10b1   :  { %v944_v45 = vadd.f32 %v1459_v44, %v942_v43 }
0x10b3   :  { %1221 = vtanh.f32 %v944_v45 }
0x10b9   :  { %v1222_v46 = vpop.eup %1221 }
0x10ba   :  { %v966_v47 = vmul.f32 %v1222_v46, %v1357_v16 }
0x10bc   :  { %v967_v8 = vadd.f32 %v966_v47, %v1359_v18 }
0x10be   :  { %970 = vrot.lane.b32.xlu1 %v967_v8, %s1232_s3  ;;  %v968_v56 = vmul.f32 %v967_v8, %v866_v21 }
0x1114   :  { %v951_v48 = vpop.permute.xlu0 %950 }
0x1115   :  { %v953_v49 = vmul.f32 %v951_v48, %v947_v40 }
0x1117   :  { %955 = vrot.lane.b32.xlu2 %v953_v49, %s1233_s26 }
0x1130   :  { %v971_v50 = vpop.permute.xlu1 %970 }
0x1131   :  { %v973_v51 = vmul.f32 %v971_v50, %v967_v8 }
0x1133   :  { %975 = vrot.lane.b32.xlu0 %v973_v51, %s1233_s26 }
0x1171   :  { %v956_v53 = vpop.permute.xlu2 %955 }
0x1172   :  { %v958_v54 = vadd.f32 %v956_v53, %v948_v52 }
0x1174   :  { %1223 = vtanh.f32 %v958_v54 }
0x117a   :  { %v1224_v55 = vpop.eup %1223 }
0x117b   :  { %961 = vrot.lane.b32.xlu1 %v1224_v55, %s1232_s3 }
0x11a5   :  { %v976_v57 = vpop.permute.xlu0 %975 }
0x11a6   :  { %v978_v58 = vadd.f32 %v976_v57, %v968_v56 }
0x11a8   :  { %1225 = vtanh.f32 %v978_v58 }
0x11ae   :  { %v1226_v59 = vpop.eup %1225 }
0x11af   :  { %981 = vrot.lane.b32.xlu2 %v1226_v59, %s1232_s3 }
0x11ed   :  { %v962_v60 = vpop.permute.xlu1 %961 }
0x11ee   :  { %v964_v61 = vmul.f32 %v962_v60, %v947_v40 }
0x11f0   :  { %1011 = vrot.lane.b32.xlu1 %v964_v61, %s1233_s26 }
0x1209   :  { %v982_v62 = vpop.permute.xlu2 %981 }
0x120a   :  { %v984_v63 = vmul.f32 %v982_v62, %v967_v8 }
0x120c   :  { %986 = vrot.lane.b32.xlu0 %v984_v63, %s1233_s26 }
0x1262   :  { %v1012_v1 = vpop.permute.xlu1 %1011 }
0x1263   :  { %1057 = vst.msk [vmem:[%s1720_s12] sm:$0xff] %vm147_vm1, %v1012_v1  ;;  %1156 = vmatmul.msk.f32.vlgmr.msrb.gmra.mxu3 %vm147_vm1, %v1012_v1 }
0x127e   :  { %v987_v3 = vpop.permute.xlu0 %986 }
0x127f   :  { %1155 = vmatmul.msk.f32.vlgmr.msrb.gmra.mxu2 %vm147_vm1, %v987_v3 }
0x12e6   :  { %v1032_v31 = vpop.f32.mrf.mxu3 }
0x1302   :  { %v1007_v4 = vpop.f32.mrf.mxu2 }
0x1303   :  { %v1033_v29 = vadd.f32 %v1032_v31, %v1007_v4 }
0x1305   :  { %v1035_v33 = vadd.f32 %v1459_v44, %v1033_v29 }
0x1307   :  { %1227 = vtanh.f32 %v1035_v33 }
0x130d   :  { %v1228_v30 = vpop.eup %1227 }
0x130e   :  { %v1037_v34 = vmul.f32 %v1228_v30, %v1357_v16  ;;  %v1079_v16 = vld [vmem:[%s1722_s9 + $0x18] sm:$0xff] }
0x130f   :  { %1101 = vmatpush.msrb.mxu0 %v1079_v16 }
0x1310   :  { %v1038_v32 = vadd.f32 %v1037_v34, %v1359_v18  ;;  %v1078_v18 = vld [vmem:[%s1722_s9 + $0x10] sm:$0xff] }
0x1311   :  { %1102 = vmatpush.msrb.mxu0 %v1078_v18 }
0x1312   :  { %1041 = vrot.lane.b32.xlu2 %v1038_v32, %s1232_s3  ;;  %v1039_v7 = vmul.f32 %v1038_v32, %v978_v58 }
0x1313   :  { %1103 = vmatpush.msrb.mxu0 %v1077_v12 }
0x1315   :  { %1104 = vmatpush.msrb.mxu0 %v1076_v13 }
0x136c   :  { %v1042_v37 = vpop.permute.xlu2 %1041 }
0x136d   :  { %v1044_v35 = vmul.f32 %v1042_v37, %v1038_v32 }
0x136f   :  { %1046 = vrot.lane.b32.xlu0 %v1044_v35, %s1233_s26 }
0x1377   :  { %1059 = vrot.lane.b32.xlu0 %v958_v54, %s1234_s2 }
0x13e1   :  { %v1047_v9 = vpop.permute.xlu0 %1046 }
0x13e2   :  { %v1049_v10 = vadd.f32 %v1047_v9, %v1039_v7 }
0x13e4   :  { %1229 = vtanh.f32 %v1049_v10 }
0x13e9   :  { %v1060_v11 = vpop.permute.xlu0 %1059 }
0x13ea   :  { %v1230_v44 = vpop.eup %1229  ;;  %1062 = vst.msk [vmem:[%s1721_s13] sm:$0xff] %vm147_vm1, %v1060_v11 }
0x13eb   :  { %1052 = vrot.lane.b32.xlu1 %v1230_v44, %s1232_s3 }
0x145d   :  { %v1053_v14 = vpop.permute.xlu1 %1052 }
0x145e   :  { %v1055_v15 = vmul.f32 %v1053_v14, %v1038_v32 }
0x1460   :  { %v1075_v17 = vmax.f32 %v1055_v15, 0.0  ;;  %1064 = vrot.lane.b32.xlu1 %v1055_v15, %s1233_s26 }
0x1462   :  { %1085 = vrot.lane.b32.xlu2 %v1075_v17, %s1233_s26 }
0x146a   :  { %1070 = vrot.lane.b32.xlu2 %v1049_v10, %s1234_s2 }
0x14bc   :  { %v1086_v19 = vpop.permute.xlu2 %1085 }
0x14bd   :  { %1159 = vmatmul.msk.f32.vlgmr.msrb.gmra.mxu0 %vm147_vm1, %v1086_v19 }
0x14c4   :  { %v1071_v20 = vpop.permute.xlu2 %1070 }
0x14c5   :  { %1158 = vst.msk [vmem:[%s1721_s13 + $0x8] sm:$0xff] %vm147_vm1, %v1071_v20 }
0x14d2   :  { %v1065_v21 = vpop.permute.xlu1 %1064 }
0x14d3   :  { %1157 = vst.msk [vmem:[%s1720_s12 + $0x8] sm:$0xff] %vm147_vm1, %v1065_v21 }
0x153a   :  { %v1106_v23 = vpop.f32.mrf.mxu0 }
0x153b   :  { %v1107_v0 = vadd.f32 %v1166_v22, %v1106_v23 }
0x153d   :  { %1110 = vst.msk [vmem:[%s1724_s11] sm:$0xff] %vm1109_vm5, %v1107_v0 }

</bundles_post_ra>
